<compile_context>
chip_gen: v5e
topology: v5e:2x2
jax: 0.10.0
libtpu: 0.0.40
codegen_flags: <defaults>
</compile_context>

<pallas_src>
import functools

import jax
import jax.numpy as jnp
from jax import lax
from jax.experimental import pallas as pl
from jax.experimental.pallas import tpu as pltpu


# ----------------------------------------------------------------------------
# Pallas kernel: channels-first, lane-dense ConvLSTM cell.
# ----------------------------------------------------------------------------
def _convlstm_kernel(xh_ref, cell_ref, w_ref, b_ref, cgw_ref, out_ref, *,
                     H, W, KH, KW, PH, PW, Ct, Co, nb,
                     forget_bias, gate_cell_state):
    # xh_ref  : (nb, Ct, H*W)      concat(input, hidden), channels-first
    # cell_ref: (nb, Co, H*W)      cell state, channels-first
    # w_ref   : (KH*KW, 4*Co, Ct)  per-tap weights, gate order [i, f, o, c]
    # b_ref   : (4*Co, 1)
    # cgw_ref : (3, Co, 1)         peephole weights for (i, f, o)
    # out_ref : (nb, 2*Co, H*W)    [new_hidden | new_cell], channels-first
    f32 = jnp.float32
    HW = H * W
    pad = PH * W + PW  # zero pad (lanes) on each side of the flattened axis

    # Column-wrap masks: tap column offset dkw = kw - PW must keep x + dkw in
    # [0, W).  Row offsets are handled for free by the flat zero padding.
    x_idx = lax.broadcasted_iota(jnp.int32, (1, HW), 1) % W
    col_masks = []
    for kw in range(KW):
        dkw = kw - PW
        if dkw == 0:
            col_masks.append(None)
        else:
            col_masks.append((x_idx + dkw >= 0) & (x_idx + dkw < W))

    bias = b_ref[...].astype(f32)                          # (4*Co, 1)

    for b in range(nb):                                    # static unroll
        xh = xh_ref[b].astype(f32)                         # (Ct, HW)
        cell = cell_ref[b].astype(f32)                     # (Co, HW)

        zpad = jnp.zeros((Ct, pad), f32)
        xh_p = jnp.concatenate([zpad, xh, zpad], axis=-1)  # (Ct, HW + 2*pad)

        # 9 accumulated per-tap matmuls, each (4*Co, Ct) x (Ct, HW): output
        # comes off the MXU channels-first (no transpose), lanes stay dense.
        acc = jnp.zeros((4 * Co, HW), f32)
        for kh in range(KH):
            for kw in range(KW):
                t = kh * KW + kw
                off = kh * W + kw                          # offset in padded axis
                win = xh_p[:, off:off + HW]                # (Ct, HW)
                m = col_masks[kw]
                if m is not None:
                    win = jnp.where(m, win, 0.0)
                w_t = w_ref[t].astype(f32)                 # (4*Co, Ct)
                acc = acc + lax.dot_general(
                    w_t, win,
                    dimension_numbers=(((1,), (0,)), ((), ())),
                    preferred_element_type=f32)
        pre = acc + bias                                   # (4*Co, HW)

        # Gate slices are sublane-tile aligned (Co == 8): no relayout.
        i_pre = pre[0 * Co:1 * Co]
        f_pre = pre[1 * Co:2 * Co]
        o_pre = pre[2 * Co:3 * Co]
        c_pre = pre[3 * Co:4 * Co]

        if gate_cell_state:
            i_pre = i_pre + cell * cgw_ref[0].astype(f32)
            f_pre = f_pre + cell * cgw_ref[1].astype(f32)
            o_pre = o_pre + cell * cgw_ref[2].astype(f32)

        i = jax.nn.sigmoid(i_pre)
        f = jax.nn.sigmoid(f_pre + forget_bias)
        o = jax.nn.sigmoid(o_pre)
        c = jnp.tanh(c_pre)

        new_cell = f * cell + i * c                        # (Co, HW)
        new_hidden = o * jnp.tanh(new_cell)                # (Co, HW)

        out_ref[b, :Co, :] = new_hidden.astype(out_ref.dtype)
        out_ref[b, Co:, :] = new_cell.astype(out_ref.dtype)


# ----------------------------------------------------------------------------
# Parameter repacking — call ONCE (hoist out of any recurrent time loop).
# ----------------------------------------------------------------------------
def pack_conv_lstm_params(weight, bias, cell_gate_weights, *, out_channels,
                          kernel_size=(3, 3)):
    Co = out_channels
    KH, KW = kernel_size
    four_co, ct, kh_, kw_ = weight.shape
    assert four_co == 4 * Co and kh_ == KH and kw_ == KW
    # torch layout (4*Co, Ct, KH, KW) -> (KH*KW, 4*Co, Ct); tap t = kh*KW + kw.
    w_packed = jnp.transpose(weight, (2, 3, 0, 1)).reshape(KH * KW, 4 * Co, ct)
    b_packed = bias.reshape(4 * Co, 1)
    if cell_gate_weights is None:
        cgw_packed = jnp.zeros((3, Co, 1), weight.dtype)
    else:
        cgw_packed = cell_gate_weights.reshape(3, Co, 1)
    return w_packed, b_packed, cgw_packed


def _tensorcores_per_chip():
    """Best-effort TensorCores/chip (v5e/v6e: 1, v7x: 2); fold batch if 1."""
    try:
        dev = jax.devices()[0]
        n = getattr(dev, "num_cores", None)
        if isinstance(n, int) and n > 0:
            return n
        kind = str(getattr(dev, "device_kind", "")).lower()
        if "7" in kind:
            return 2
    except Exception:
        pass
    return 1


# ----------------------------------------------------------------------------
# Wrapper (NCHW in / NCHW out, matching the PyTorch module).
# ----------------------------------------------------------------------------
def conv_lstm_cell_pallas(inputs, hidden_states, w_packed, b_packed, cgw_packed,
                          *, out_channels, kernel_size=(3, 3), stride=(1, 1),
                          padding=(1, 1), dilation=(1, 1), groups=1,
                          forget_bias=1.0, gate_cell_state=False,
                          fold_batch=None):
    assert tuple(stride) == (1, 1), "only stride=1 supported"
    assert tuple(dilation) == (1, 1), "only dilation=1 supported"
    assert groups == 1, "only groups=1 supported"

    B, Cin, H, W = inputs.shape
    Co = out_channels
    KH, KW = kernel_size
    PH, PW = padding
    Ct = Cin + Co
    HW = H * W
    assert H + 2 * PH - KH + 1 == H and W + 2 * PW - KW + 1 == W, \
        "'same'-sized output (KH = 2*PH+1, KW = 2*PW+1) required"

    # Channels-first, lane-dense layouts: no NCHW<->NHWC transposes at all,
    # only a channel concat plus free reshapes.
    xh = jnp.concatenate([inputs, hidden_states[:, :Co]], axis=1).reshape(B, Ct, HW)
    cell = hidden_states[:, Co:].reshape(B, Co, HW)

    if fold_batch is None:
        # Single-TC chips (v5e/v6e): fold the batch into one grid step.
        # Multi-TC (v7x): keep grid=(B,) so batches can shard across cores.
        fold_batch = _tensorcores_per_chip() < 2
    nb = B if fold_batch else 1

    kern = functools.partial(
        _convlstm_kernel, H=H, W=W, KH=KH, KW=KW, PH=PH, PW=PW,
        Ct=Ct, Co=Co, nb=nb, forget_bias=forget_bias,
        gate_cell_state=gate_cell_state)

    nhs_flat = pl.pallas_call(
        kern,
        # NOTE: output follows hidden_states.dtype; keep states f32 for long
        # rollouts (a bf16 state would round the recurrent cell every step).
        out_shape=jax.ShapeDtypeStruct((B, 2 * Co, HW), hidden_states.dtype),
        grid_spec=pltpu.PrefetchScalarGridSpec(
            num_scalar_prefetch=0,
            grid=(B // nb,),
            in_specs=[
                pl.BlockSpec((nb, Ct, HW), lambda g: (g, 0, 0)),
                pl.BlockSpec((nb, Co, HW), lambda g: (g, 0, 0)),
                pl.BlockSpec((KH * KW, 4 * Co, Ct), lambda g: (0, 0, 0)),
                pl.BlockSpec((4 * Co, 1), lambda g: (0, 0)),
                pl.BlockSpec((3, Co, 1), lambda g: (0, 0, 0)),
            ],
            out_specs=pl.BlockSpec((nb, 2 * Co, HW), lambda g: (g, 0, 0)),
        ),
        # TODO(synk): on v7x verify in a trace that the 2 grid steps shard
        # across both TensorCores; otherwise switch to pltpu.CORE_PARALLEL or
        # an explicit pl.core_map split.
        compiler_params=pltpu.CompilerParams(
            dimension_semantics=("parallel",)),
    )(xh, cell, w_packed, b_packed, cgw_packed)

    # (B, 2*Co, H*W) is already channels-first: free reshape to NCHW, and the
    # hidden output is just a slice of the new hidden states.
    new_hidden_states = nhs_flat.reshape(B, 2 * Co, H, W)
    return new_hidden_states[:, :Co], new_hidden_states


# ----------------------------------------------------------------------------
# Plain-JAX reference (NCHW), mirrors the PyTorch forward.
# (gate_cell_state uses Shi et al. semantics: cell tiled per gate.)
# ----------------------------------------------------------------------------
def conv_lstm_cell_ref(inputs, hidden_states, weight, bias, cgw, *,
                       out_channels, padding, forget_bias, gate_cell_state):
    Co = out_channels
    hidden, cell = hidden_states[:, :Co], hidden_states[:, Co:]
    xh = jnp.concatenate([inputs, hidden], axis=1)
    ifoc = lax.conv_general_dilated(
        xh, weight, window_strides=(1, 1),
        padding=[(padding[0], padding[0]), (padding[1], padding[1])],
        dimension_numbers=('NCHW', 'OIHW', 'NCHW'),
        precision=lax.Precision.HIGHEST)
    ifoc = ifoc + bias[None, :, None, None]
    ifo, c = ifoc[:, :-Co], ifoc[:, -Co:]
    if gate_cell_state:
        cell3 = jnp.concatenate([cell, cell, cell], axis=1)
        ifo = ifo + cell3 * cgw.reshape(1, 3 * Co, 1, 1)
    i, f, o = ifo[:, :Co], ifo[:, Co:2 * Co], ifo[:, 2 * Co:]
    i = jax.nn.sigmoid(i)
    f = jax.nn.sigmoid(f + forget_bias)
    o = jax.nn.sigmoid(o)
    c = jnp.tanh(c)
    new_cell = f * cell + i * c
    new_hidden = o * jnp.tanh(new_cell)
    return new_hidden, jnp.concatenate([new_hidden, new_cell], axis=1)


if __name__ == "__main__":
    # Module config: in_channels=4, out_channels=8, kernel_size=3, padding=1
    B, Cin, H, W = 2, 4, 16, 16
    Co = 8
    KH = KW = 3
    pad_hw = (1, 1)
    forget_bias = 1.0
    Ct = Cin + Co

    key = jax.random.PRNGKey(0)
    kx, kh_, kw_, kb, kc = jax.random.split(key, 5)

    # Deterministic parameter init (xavier-uniform-style weight), torch Conv2d
    # weight layout: (out=4*Co, in=Cin_tot, KH, KW).  The module inits the
    # bias to zero; a small non-zero bias is used here to exercise that path.
    fan_in = Ct * KH * KW
    fan_out = 4 * Co * KH * KW
    bound = (6.0 / (fan_in + fan_out)) ** 0.5
    weight = jax.random.uniform(kw_, (4 * Co, Ct, KH, KW),
                                jnp.float32, -bound, bound)
    bias = 0.05 * jax.random.normal(kb, (4 * Co,), jnp.float32)

    inputs = jax.random.normal(kx, (B, Cin, H, W), jnp.float32)
    hidden_states = jax.random.normal(kh_, (B, 2 * Co, H, W), jnp.float32)

    # ---- path 1: default gating, batch folded into one grid step (v5e/v6e) ----
    w_p, b_p, cgw_p = pack_conv_lstm_params(
        weight, bias, None, out_channels=Co, kernel_size=(KH, KW))
    nh, nhs = conv_lstm_cell_pallas(
        inputs, hidden_states, w_p, b_p, cgw_p, out_channels=Co,
        kernel_size=(KH, KW), padding=pad_hw, forget_bias=forget_bias,
        gate_cell_state=False, fold_batch=True)
    jax.block_until_ready((nh, nhs))

    ref_h, ref_hs = conv_lstm_cell_ref(
        inputs, hidden_states, weight, bias,
        jnp.zeros((1, 3 * Co, 1, 1), jnp.float32),
        out_channels=Co, padding=pad_hw, forget_bias=forget_bias,
        gate_cell_state=False)

    assert nh.shape == (B, Co, H, W)
    assert nhs.shape == (B, 2 * Co, H, W)
    assert jnp.allclose(nh, ref_h, atol=1e-4, rtol=1e-4)
    assert jnp.allclose(nhs, ref_hs, atol=1e-4, rtol=1e-4)

    # ---- path 2: peephole gating, per-batch parallel grid (v7x config) ----
    cgw = 0.1 * jax.random.normal(kc, (1, 3 * Co, 1, 1), jnp.float32)
    w_p2, b_p2, cgw_p2 = pack_conv_lstm_params(
        weight, bias, cgw, out_channels=Co, kernel_size=(KH, KW))
    nh2, nhs2 = conv_lstm_cell_pallas(
        inputs, hidden_states, w_p2, b_p2, cgw_p2, out_channels=Co,
        kernel_size=(KH, KW), padding=pad_hw, forget_bias=forget_bias,
        gate_cell_state=True, fold_batch=False)
    jax.block_until_ready((nh2, nhs2))

    ref_h2, ref_hs2 = conv_lstm_cell_ref(
        inputs, hidden_states, weight, bias, cgw,
        out_channels=Co, padding=pad_hw, forget_bias=forget_bias,
        gate_cell_state=True)

    assert jnp.allclose(nh2, ref_h2, atol=1e-4, rtol=1e-4)
    assert jnp.allclose(nhs2, ref_hs2, atol=1e-4, rtol=1e-4)

    # ---- path 3: auto (generation-aware) batch tiling ----
    nh3, nhs3 = conv_lstm_cell_pallas(
        inputs, hidden_states, w_p, b_p, cgw_p, out_channels=Co,
        kernel_size=(KH, KW), padding=pad_hw, forget_bias=forget_bias,
        gate_cell_state=False)
    jax.block_until_ready((nh3, nhs3))
    assert jnp.allclose(nhs3, ref_hs, atol=1e-4, rtol=1e-4)

    print("KERNEL_OK")
</pallas_src>

<mosaic_0001>
module attributes {stable_mosaic.version = 11 : i64} {
  func.func @_convlstm_kernel(%arg0: i32, %arg1: memref<2x12x256xf32, #tpu.memory_space<vmem>>, %arg2: memref<2x8x256xf32, #tpu.memory_space<vmem>>, %arg3: memref<9x32x12xf32, #tpu.memory_space<vmem>>, %arg4: memref<32x1xf32, #tpu.memory_space<vmem>>, %arg5: memref<3x8x1xf32, #tpu.memory_space<vmem>>, %arg6: memref<2x16x256xf32, #tpu.memory_space<vmem>>) attributes {dimension_semantics = [#tpu.dimension_semantics<parallel>], iteration_bounds = array<i64: 1>, scalar_prefetch = 0 : i64, scratch_operands = 0 : i64, tpu.core_type = #tpu.core_type<tc>, window_params = [{transform_indices = @transform_0, window_bounds = array<i64: 2, 12, 256>}, {transform_indices = @transform_1, window_bounds = array<i64: 2, 8, 256>}, {pipeline_mode = #tpu.pipeline_mode<synchronous>, transform_indices = @transform_2, window_bounds = array<i64: 9, 32, 12>}, {pipeline_mode = #tpu.pipeline_mode<synchronous>, transform_indices = @transform_3, window_bounds = array<i64: 32, 1>}, {pipeline_mode = #tpu.pipeline_mode<synchronous>, transform_indices = @transform_4, window_bounds = array<i64: 3, 8, 1>}, {transform_indices = @transform_5, window_bounds = array<i64: 2, 16, 256>}]} {
    %0 = tpu.iota {dimensions = array<i32: 1>} : vector<1x256xi32>
    %c16_i32 = arith.constant 16 : i32
    %c0_i32 = arith.constant 0 : i32
    %1 = arith.cmpi eq, %c16_i32, %c0_i32 : i32
    %c1_i32 = arith.constant 1 : i32
    %2 = arith.select %1, %c1_i32, %c16_i32 : i32
    %3 = vector.broadcast %2 : i32 to vector<1x256xi32>
    %4 = arith.remsi %0, %3 : vector<1x256xi32>
    %c0_i32_0 = arith.constant 0 : i32
    %5 = vector.broadcast %c0_i32_0 : i32 to vector<1x256xi32>
    %6 = arith.cmpi ne, %4, %5 : vector<1x256xi32>
    %c0_i32_1 = arith.constant 0 : i32
    %7 = vector.broadcast %c0_i32_1 : i32 to vector<1x256xi32>
    %8 = arith.cmpi slt, %4, %7 : vector<1x256xi32>
    %c0_i32_2 = arith.constant 0 : i32
    %9 = arith.cmpi slt, %2, %c0_i32_2 : i32
    %10 = vector.broadcast %9 : i1 to vector<1x256xi1>
    %11 = vector.broadcast %10 : vector<1x256xi1> to vector<1x256xi1>
    %12 = arith.xori %8, %11 : vector<1x256xi1>
    %13 = arith.andi %12, %6 : vector<1x256xi1>
    %14 = vector.broadcast %2 : i32 to vector<1x256xi32>
    %15 = arith.addi %4, %14 : vector<1x256xi32>
    %16 = arith.select %13, %15, %4 : vector<1x256xi1>, vector<1x256xi32>
    %c-1_i32 = arith.constant -1 : i32
    %17 = vector.broadcast %c-1_i32 : i32 to vector<1x256xi32>
    %18 = arith.addi %16, %17 : vector<1x256xi32>
    %c0_i32_3 = arith.constant 0 : i32
    %19 = vector.broadcast %c0_i32_3 : i32 to vector<1x256xi32>
    %20 = arith.cmpi sge, %18, %19 : vector<1x256xi32>
    %c-1_i32_4 = arith.constant -1 : i32
    %21 = vector.broadcast %c-1_i32_4 : i32 to vector<1x256xi32>
    %22 = arith.addi %16, %21 : vector<1x256xi32>
    %c16_i32_5 = arith.constant 16 : i32
    %23 = vector.broadcast %c16_i32_5 : i32 to vector<1x256xi32>
    %24 = arith.cmpi slt, %22, %23 : vector<1x256xi32>
    %25 = arith.andi %20, %24 : vector<1x256xi1>
    %c1_i32_6 = arith.constant 1 : i32
    %26 = vector.broadcast %c1_i32_6 : i32 to vector<1x256xi32>
    %27 = arith.addi %16, %26 : vector<1x256xi32>
    %c0_i32_7 = arith.constant 0 : i32
    %28 = vector.broadcast %c0_i32_7 : i32 to vector<1x256xi32>
    %29 = arith.cmpi sge, %27, %28 : vector<1x256xi32>
    %c1_i32_8 = arith.constant 1 : i32
    %30 = vector.broadcast %c1_i32_8 : i32 to vector<1x256xi32>
    %31 = arith.addi %16, %30 : vector<1x256xi32>
    %c16_i32_9 = arith.constant 16 : i32
    %32 = vector.broadcast %c16_i32_9 : i32 to vector<1x256xi32>
    %33 = arith.cmpi slt, %31, %32 : vector<1x256xi32>
    %34 = arith.andi %29, %33 : vector<1x256xi1>
    %c0 = arith.constant 0 : index
    %c0_10 = arith.constant 0 : index
    %35 = vector.load %arg4[%c0, %c0_10] : memref<32x1xf32, #tpu.memory_space<vmem>>, vector<32x1xf32>
    %c0_11 = arith.constant 0 : index
    %c0_12 = arith.constant 0 : index
    %c0_13 = arith.constant 0 : index
    %36 = vector.load %arg1[%c0_11, %c0_12, %c0_13] : memref<2x12x256xf32, #tpu.memory_space<vmem>>, vector<1x12x256xf32>
    %37 = vector.shape_cast %36 : vector<1x12x256xf32> to vector<12x256xf32>
    %c0_14 = arith.constant 0 : index
    %c0_15 = arith.constant 0 : index
    %c0_16 = arith.constant 0 : index
    %38 = vector.load %arg2[%c0_14, %c0_15, %c0_16] : memref<2x8x256xf32, #tpu.memory_space<vmem>>, vector<1x8x256xf32>
    %39 = vector.shape_cast %38 : vector<1x8x256xf32> to vector<8x256xf32>
    %cst = arith.constant 0.000000e+00 : f32
    %40 = vector.broadcast %cst : f32 to vector<12x17xf32>
    %41 = tpu.concatenate %40, %37, %40 in 1 : vector<12x17xf32>, vector<12x256xf32>, vector<12x17xf32> -> vector<12x290xf32>
    %cst_17 = arith.constant 0.000000e+00 : f32
    %42 = vector.broadcast %cst_17 : f32 to vector<32x256xf32>
    %43 = vector.extract_strided_slice %41 {offsets = [0, 0], sizes = [12, 256], strides = [1, 1]} : vector<12x290xf32> to vector<12x256xf32>
    %cst_18 = arith.constant 0.000000e+00 : f32
    %44 = vector.shape_cast %25 : vector<1x256xi1> to vector<1x256xi1>
    %45 = vector.broadcast %44 : vector<1x256xi1> to vector<12x256xi1>
    %46 = vector.broadcast %cst_18 : f32 to vector<12x256xf32>
    %47 = arith.select %45, %43, %46 : vector<12x256xi1>, vector<12x256xf32>
    %c0_19 = arith.constant 0 : index
    %c0_20 = arith.constant 0 : index
    %c0_21 = arith.constant 0 : index
    %48 = vector.load %arg3[%c0_19, %c0_20, %c0_21] : memref<9x32x12xf32, #tpu.memory_space<vmem>>, vector<1x32x12xf32>
    %49 = vector.shape_cast %48 : vector<1x32x12xf32> to vector<32x12xf32>
    %cst_22 = arith.constant dense<0.000000e+00> : vector<32x256xf32>
    %50 = tpu.matmul %49, %47, %cst_22 {dimension_numbers = #tpu.dot_dimension_numbers<[1], [0], [0], [1], [0, 0, 1, 1], [], []>} : vector<32x12xf32>, vector<12x256xf32>, vector<32x256xf32> -> vector<32x256xf32>
    %51 = arith.addf %42, %50 : vector<32x256xf32>
    %52 = vector.extract_strided_slice %41 {offsets = [0, 1], sizes = [12, 256], strides = [1, 1]} : vector<12x290xf32> to vector<12x256xf32>
    %c1 = arith.constant 1 : index
    %c0_23 = arith.constant 0 : index
    %c0_24 = arith.constant 0 : index
    %53 = vector.load %arg3[%c1, %c0_23, %c0_24] : memref<9x32x12xf32, #tpu.memory_space<vmem>>, vector<1x32x12xf32>
    %54 = vector.shape_cast %53 : vector<1x32x12xf32> to vector<32x12xf32>
    %cst_25 = arith.constant dense<0.000000e+00> : vector<32x256xf32>
    %55 = tpu.matmul %54, %52, %cst_25 {dimension_numbers = #tpu.dot_dimension_numbers<[1], [0], [0], [1], [0, 0, 1, 1], [], []>} : vector<32x12xf32>, vector<12x256xf32>, vector<32x256xf32> -> vector<32x256xf32>
    %56 = arith.addf %51, %55 : vector<32x256xf32>
    %57 = vector.extract_strided_slice %41 {offsets = [0, 2], sizes = [12, 256], strides = [1, 1]} : vector<12x290xf32> to vector<12x256xf32>
    %cst_26 = arith.constant 0.000000e+00 : f32
    %58 = vector.shape_cast %34 : vector<1x256xi1> to vector<1x256xi1>
    %59 = vector.broadcast %58 : vector<1x256xi1> to vector<12x256xi1>
    %60 = vector.broadcast %cst_26 : f32 to vector<12x256xf32>
    %61 = arith.select %59, %57, %60 : vector<12x256xi1>, vector<12x256xf32>
    %c2 = arith.constant 2 : index
    %c0_27 = arith.constant 0 : index
    %c0_28 = arith.constant 0 : index
    %62 = vector.load %arg3[%c2, %c0_27, %c0_28] : memref<9x32x12xf32, #tpu.memory_space<vmem>>, vector<1x32x12xf32>
    %63 = vector.shape_cast %62 : vector<1x32x12xf32> to vector<32x12xf32>
    %cst_29 = arith.constant dense<0.000000e+00> : vector<32x256xf32>
    %64 = tpu.matmul %63, %61, %cst_29 {dimension_numbers = #tpu.dot_dimension_numbers<[1], [0], [0], [1], [0, 0, 1, 1], [], []>} : vector<32x12xf32>, vector<12x256xf32>, vector<32x256xf32> -> vector<32x256xf32>
    %65 = arith.addf %56, %64 : vector<32x256xf32>
    %66 = vector.extract_strided_slice %41 {offsets = [0, 16], sizes = [12, 256], strides = [1, 1]} : vector<12x290xf32> to vector<12x256xf32>
    %cst_30 = arith.constant 0.000000e+00 : f32
    %67 = vector.shape_cast %25 : vector<1x256xi1> to vector<1x256xi1>
    %68 = vector.broadcast %67 : vector<1x256xi1> to vector<12x256xi1>
    %69 = vector.broadcast %cst_30 : f32 to vector<12x256xf32>
    %70 = arith.select %68, %66, %69 : vector<12x256xi1>, vector<12x256xf32>
    %c3 = arith.constant 3 : index
    %c0_31 = arith.constant 0 : index
    %c0_32 = arith.constant 0 : index
    %71 = vector.load %arg3[%c3, %c0_31, %c0_32] : memref<9x32x12xf32, #tpu.memory_space<vmem>>, vector<1x32x12xf32>
    %72 = vector.shape_cast %71 : vector<1x32x12xf32> to vector<32x12xf32>
    %cst_33 = arith.constant dense<0.000000e+00> : vector<32x256xf32>
    %73 = tpu.matmul %72, %70, %cst_33 {dimension_numbers = #tpu.dot_dimension_numbers<[1], [0], [0], [1], [0, 0, 1, 1], [], []>} : vector<32x12xf32>, vector<12x256xf32>, vector<32x256xf32> -> vector<32x256xf32>
    %74 = arith.addf %65, %73 : vector<32x256xf32>
    %75 = vector.extract_strided_slice %41 {offsets = [0, 17], sizes = [12, 256], strides = [1, 1]} : vector<12x290xf32> to vector<12x256xf32>
    %c4 = arith.constant 4 : index
    %c0_34 = arith.constant 0 : index
    %c0_35 = arith.constant 0 : index
    %76 = vector.load %arg3[%c4, %c0_34, %c0_35] : memref<9x32x12xf32, #tpu.memory_space<vmem>>, vector<1x32x12xf32>
    %77 = vector.shape_cast %76 : vector<1x32x12xf32> to vector<32x12xf32>
    %cst_36 = arith.constant dense<0.000000e+00> : vector<32x256xf32>
    %78 = tpu.matmul %77, %75, %cst_36 {dimension_numbers = #tpu.dot_dimension_numbers<[1], [0], [0], [1], [0, 0, 1, 1], [], []>} : vector<32x12xf32>, vector<12x256xf32>, vector<32x256xf32> -> vector<32x256xf32>
    %79 = arith.addf %74, %78 : vector<32x256xf32>
    %80 = vector.extract_strided_slice %41 {offsets = [0, 18], sizes = [12, 256], strides = [1, 1]} : vector<12x290xf32> to vector<12x256xf32>
    %cst_37 = arith.constant 0.000000e+00 : f32
    %81 = vector.shape_cast %34 : vector<1x256xi1> to vector<1x256xi1>
    %82 = vector.broadcast %81 : vector<1x256xi1> to vector<12x256xi1>
    %83 = vector.broadcast %cst_37 : f32 to vector<12x256xf32>
    %84 = arith.select %82, %80, %83 : vector<12x256xi1>, vector<12x256xf32>
    %c5 = arith.constant 5 : index
    %c0_38 = arith.constant 0 : index
    %c0_39 = arith.constant 0 : index
    %85 = vector.load %arg3[%c5, %c0_38, %c0_39] : memref<9x32x12xf32, #tpu.memory_space<vmem>>, vector<1x32x12xf32>
    %86 = vector.shape_cast %85 : vector<1x32x12xf32> to vector<32x12xf32>
    %cst_40 = arith.constant dense<0.000000e+00> : vector<32x256xf32>
    %87 = tpu.matmul %86, %84, %cst_40 {dimension_numbers = #tpu.dot_dimension_numbers<[1], [0], [0], [1], [0, 0, 1, 1], [], []>} : vector<32x12xf32>, vector<12x256xf32>, vector<32x256xf32> -> vector<32x256xf32>
    %88 = arith.addf %79, %87 : vector<32x256xf32>
    %89 = vector.extract_strided_slice %41 {offsets = [0, 32], sizes = [12, 256], strides = [1, 1]} : vector<12x290xf32> to vector<12x256xf32>
    %cst_41 = arith.constant 0.000000e+00 : f32
    %90 = vector.shape_cast %25 : vector<1x256xi1> to vector<1x256xi1>
    %91 = vector.broadcast %90 : vector<1x256xi1> to vector<12x256xi1>
    %92 = vector.broadcast %cst_41 : f32 to vector<12x256xf32>
    %93 = arith.select %91, %89, %92 : vector<12x256xi1>, vector<12x256xf32>
    %c6 = arith.constant 6 : index
    %c0_42 = arith.constant 0 : index
    %c0_43 = arith.constant 0 : index
    %94 = vector.load %arg3[%c6, %c0_42, %c0_43] : memref<9x32x12xf32, #tpu.memory_space<vmem>>, vector<1x32x12xf32>
    %95 = vector.shape_cast %94 : vector<1x32x12xf32> to vector<32x12xf32>
    %cst_44 = arith.constant dense<0.000000e+00> : vector<32x256xf32>
    %96 = tpu.matmul %95, %93, %cst_44 {dimension_numbers = #tpu.dot_dimension_numbers<[1], [0], [0], [1], [0, 0, 1, 1], [], []>} : vector<32x12xf32>, vector<12x256xf32>, vector<32x256xf32> -> vector<32x256xf32>
    %97 = arith.addf %88, %96 : vector<32x256xf32>
    %98 = vector.extract_strided_slice %41 {offsets = [0, 33], sizes = [12, 256], strides = [1, 1]} : vector<12x290xf32> to vector<12x256xf32>
    %c7 = arith.constant 7 : index
    %c0_45 = arith.constant 0 : index
    %c0_46 = arith.constant 0 : index
    %99 = vector.load %arg3[%c7, %c0_45, %c0_46] : memref<9x32x12xf32, #tpu.memory_space<vmem>>, vector<1x32x12xf32>
    %100 = vector.shape_cast %99 : vector<1x32x12xf32> to vector<32x12xf32>
    %cst_47 = arith.constant dense<0.000000e+00> : vector<32x256xf32>
    %101 = tpu.matmul %100, %98, %cst_47 {dimension_numbers = #tpu.dot_dimension_numbers<[1], [0], [0], [1], [0, 0, 1, 1], [], []>} : vector<32x12xf32>, vector<12x256xf32>, vector<32x256xf32> -> vector<32x256xf32>
    %102 = arith.addf %97, %101 : vector<32x256xf32>
    %103 = vector.extract_strided_slice %41 {offsets = [0, 34], sizes = [12, 256], strides = [1, 1]} : vector<12x290xf32> to vector<12x256xf32>
    %cst_48 = arith.constant 0.000000e+00 : f32
    %104 = vector.shape_cast %34 : vector<1x256xi1> to vector<1x256xi1>
    %105 = vector.broadcast %104 : vector<1x256xi1> to vector<12x256xi1>
    %106 = vector.broadcast %cst_48 : f32 to vector<12x256xf32>
    %107 = arith.select %105, %103, %106 : vector<12x256xi1>, vector<12x256xf32>
    %c8 = arith.constant 8 : index
    %c0_49 = arith.constant 0 : index
    %c0_50 = arith.constant 0 : index
    %108 = vector.load %arg3[%c8, %c0_49, %c0_50] : memref<9x32x12xf32, #tpu.memory_space<vmem>>, vector<1x32x12xf32>
    %109 = vector.shape_cast %108 : vector<1x32x12xf32> to vector<32x12xf32>
    %cst_51 = arith.constant dense<0.000000e+00> : vector<32x256xf32>
    %110 = tpu.matmul %109, %107, %cst_51 {dimension_numbers = #tpu.dot_dimension_numbers<[1], [0], [0], [1], [0, 0, 1, 1], [], []>} : vector<32x12xf32>, vector<12x256xf32>, vector<32x256xf32> -> vector<32x256xf32>
    %111 = arith.addf %102, %110 : vector<32x256xf32>
    %112 = vector.broadcast %35 : vector<32x1xf32> to vector<32x256xf32>
    %113 = arith.addf %111, %112 : vector<32x256xf32>
    %114 = vector.extract_strided_slice %113 {offsets = [0, 0], sizes = [8, 256], strides = [1, 1]} : vector<32x256xf32> to vector<8x256xf32>
    %115 = vector.extract_strided_slice %113 {offsets = [8, 0], sizes = [8, 256], strides = [1, 1]} : vector<32x256xf32> to vector<8x256xf32>
    %116 = vector.extract_strided_slice %113 {offsets = [16, 0], sizes = [8, 256], strides = [1, 1]} : vector<32x256xf32> to vector<8x256xf32>
    %117 = vector.extract_strided_slice %113 {offsets = [24, 0], sizes = [8, 256], strides = [1, 1]} : vector<32x256xf32> to vector<8x256xf32>
    %118 = arith.negf %114 : vector<8x256xf32>
    %119 = math.exp %118 : vector<8x256xf32>
    %cst_52 = arith.constant 1.000000e+00 : f32
    %120 = vector.broadcast %cst_52 : f32 to vector<8x256xf32>
    %121 = arith.addf %120, %119 : vector<8x256xf32>
    %122 = arith.divf %120, %121 : vector<8x256xf32>
    %cst_53 = arith.constant 1.000000e+00 : f32
    %123 = vector.broadcast %cst_53 : f32 to vector<8x256xf32>
    %124 = arith.addf %115, %123 : vector<8x256xf32>
    %125 = arith.negf %124 : vector<8x256xf32>
    %126 = math.exp %125 : vector<8x256xf32>
    %cst_54 = arith.constant 1.000000e+00 : f32
    %127 = vector.broadcast %cst_54 : f32 to vector<8x256xf32>
    %128 = arith.addf %127, %126 : vector<8x256xf32>
    %129 = arith.divf %127, %128 : vector<8x256xf32>
    %130 = arith.negf %116 : vector<8x256xf32>
    %131 = math.exp %130 : vector<8x256xf32>
    %cst_55 = arith.constant 1.000000e+00 : f32
    %132 = vector.broadcast %cst_55 : f32 to vector<8x256xf32>
    %133 = arith.addf %132, %131 : vector<8x256xf32>
    %134 = arith.divf %132, %133 : vector<8x256xf32>
    %135 = math.tanh %117 : vector<8x256xf32>
    %136 = arith.mulf %129, %39 : vector<8x256xf32>
    %137 = arith.mulf %122, %135 : vector<8x256xf32>
    %138 = arith.addf %136, %137 : vector<8x256xf32>
    %139 = math.tanh %138 : vector<8x256xf32>
    %140 = arith.mulf %134, %139 : vector<8x256xf32>
    %c0_56 = arith.constant 0 : index
    %c0_57 = arith.constant 0 : index
    %c0_58 = arith.constant 0 : index
    %141 = vector.load %arg6[%c0_56, %c0_57, %c0_58] : memref<2x16x256xf32, #tpu.memory_space<vmem>>, vector<1x8x256xf32>
    %142 = vector.shape_cast %141 : vector<1x8x256xf32> to vector<8x256xf32>
    %143 = vector.shape_cast %140 : vector<8x256xf32> to vector<1x8x256xf32>
    tpu.vector_store %arg6[%c0_56, %c0_57, %c0_58], %143 {strides = array<i32>} : memref<2x16x256xf32, #tpu.memory_space<vmem>>, vector<1x8x256xf32>,
    %c0_59 = arith.constant 0 : index
    %c8_60 = arith.constant 8 : index
    %c0_61 = arith.constant 0 : index
    %144 = vector.load %arg6[%c0_59, %c8_60, %c0_61] : memref<2x16x256xf32, #tpu.memory_space<vmem>>, vector<1x8x256xf32>
    %145 = vector.shape_cast %144 : vector<1x8x256xf32> to vector<8x256xf32>
    %146 = vector.shape_cast %138 : vector<8x256xf32> to vector<1x8x256xf32>
    tpu.vector_store %arg6[%c0_59, %c8_60, %c0_61], %146 {strides = array<i32>} : memref<2x16x256xf32, #tpu.memory_space<vmem>>, vector<1x8x256xf32>,
    %c1_62 = arith.constant 1 : index
    %c0_63 = arith.constant 0 : index
    %c0_64 = arith.constant 0 : index
    %147 = vector.load %arg1[%c1_62, %c0_63, %c0_64] : memref<2x12x256xf32, #tpu.memory_space<vmem>>, vector<1x12x256xf32>
    %148 = vector.shape_cast %147 : vector<1x12x256xf32> to vector<12x256xf32>
    %c1_65 = arith.constant 1 : index
    %c0_66 = arith.constant 0 : index
    %c0_67 = arith.constant 0 : index
    %149 = vector.load %arg2[%c1_65, %c0_66, %c0_67] : memref<2x8x256xf32, #tpu.memory_space<vmem>>, vector<1x8x256xf32>
    %150 = vector.shape_cast %149 : vector<1x8x256xf32> to vector<8x256xf32>
    %cst_68 = arith.constant 0.000000e+00 : f32
    %151 = vector.broadcast %cst_68 : f32 to vector<12x17xf32>
    %152 = tpu.concatenate %151, %148, %151 in 1 : vector<12x17xf32>, vector<12x256xf32>, vector<12x17xf32> -> vector<12x290xf32>
    %cst_69 = arith.constant 0.000000e+00 : f32
    %153 = vector.broadcast %cst_69 : f32 to vector<32x256xf32>
    %154 = vector.extract_strided_slice %152 {offsets = [0, 0], sizes = [12, 256], strides = [1, 1]} : vector<12x290xf32> to vector<12x256xf32>
    %cst_70 = arith.constant 0.000000e+00 : f32
    %155 = vector.shape_cast %25 : vector<1x256xi1> to vector<1x256xi1>
    %156 = vector.broadcast %155 : vector<1x256xi1> to vector<12x256xi1>
    %157 = vector.broadcast %cst_70 : f32 to vector<12x256xf32>
    %158 = arith.select %156, %154, %157 : vector<12x256xi1>, vector<12x256xf32>
    %c0_71 = arith.constant 0 : index
    %c0_72 = arith.constant 0 : index
    %c0_73 = arith.constant 0 : index
    %159 = vector.load %arg3[%c0_71, %c0_72, %c0_73] : memref<9x32x12xf32, #tpu.memory_space<vmem>>, vector<1x32x12xf32>
    %160 = vector.shape_cast %159 : vector<1x32x12xf32> to vector<32x12xf32>
    %cst_74 = arith.constant dense<0.000000e+00> : vector<32x256xf32>
    %161 = tpu.matmul %160, %158, %cst_74 {dimension_numbers = #tpu.dot_dimension_numbers<[1], [0], [0], [1], [0, 0, 1, 1], [], []>} : vector<32x12xf32>, vector<12x256xf32>, vector<32x256xf32> -> vector<32x256xf32>
    %162 = arith.addf %153, %161 : vector<32x256xf32>
    %163 = vector.extract_strided_slice %152 {offsets = [0, 1], sizes = [12, 256], strides = [1, 1]} : vector<12x290xf32> to vector<12x256xf32>
    %c1_75 = arith.constant 1 : index
    %c0_76 = arith.constant 0 : index
    %c0_77 = arith.constant 0 : index
    %164 = vector.load %arg3[%c1_75, %c0_76, %c0_77] : memref<9x32x12xf32, #tpu.memory_space<vmem>>, vector<1x32x12xf32>
    %165 = vector.shape_cast %164 : vector<1x32x12xf32> to vector<32x12xf32>
    %cst_78 = arith.constant dense<0.000000e+00> : vector<32x256xf32>
    %166 = tpu.matmul %165, %163, %cst_78 {dimension_numbers = #tpu.dot_dimension_numbers<[1], [0], [0], [1], [0, 0, 1, 1], [], []>} : vector<32x12xf32>, vector<12x256xf32>, vector<32x256xf32> -> vector<32x256xf32>
    %167 = arith.addf %162, %166 : vector<32x256xf32>
    %168 = vector.extract_strided_slice %152 {offsets = [0, 2], sizes = [12, 256], strides = [1, 1]} : vector<12x290xf32> to vector<12x256xf32>
    %cst_79 = arith.constant 0.000000e+00 : f32
    %169 = vector.shape_cast %34 : vector<1x256xi1> to vector<1x256xi1>
    %170 = vector.broadcast %169 : vector<1x256xi1> to vector<12x256xi1>
    %171 = vector.broadcast %cst_79 : f32 to vector<12x256xf32>
    %172 = arith.select %170, %168, %171 : vector<12x256xi1>, vector<12x256xf32>
    %c2_80 = arith.constant 2 : index
    %c0_81 = arith.constant 0 : index
    %c0_82 = arith.constant 0 : index
    %173 = vector.load %arg3[%c2_80, %c0_81, %c0_82] : memref<9x32x12xf32, #tpu.memory_space<vmem>>, vector<1x32x12xf32>
    %174 = vector.shape_cast %173 : vector<1x32x12xf32> to vector<32x12xf32>
    %cst_83 = arith.constant dense<0.000000e+00> : vector<32x256xf32>
    %175 = tpu.matmul %174, %172, %cst_83 {dimension_numbers = #tpu.dot_dimension_numbers<[1], [0], [0], [1], [0, 0, 1, 1], [], []>} : vector<32x12xf32>, vector<12x256xf32>, vector<32x256xf32> -> vector<32x256xf32>
    %176 = arith.addf %167, %175 : vector<32x256xf32>
    %177 = vector.extract_strided_slice %152 {offsets = [0, 16], sizes = [12, 256], strides = [1, 1]} : vector<12x290xf32> to vector<12x256xf32>
    %cst_84 = arith.constant 0.000000e+00 : f32
    %178 = vector.shape_cast %25 : vector<1x256xi1> to vector<1x256xi1>
    %179 = vector.broadcast %178 : vector<1x256xi1> to vector<12x256xi1>
    %180 = vector.broadcast %cst_84 : f32 to vector<12x256xf32>
    %181 = arith.select %179, %177, %180 : vector<12x256xi1>, vector<12x256xf32>
    %c3_85 = arith.constant 3 : index
    %c0_86 = arith.constant 0 : index
    %c0_87 = arith.constant 0 : index
    %182 = vector.load %arg3[%c3_85, %c0_86, %c0_87] : memref<9x32x12xf32, #tpu.memory_space<vmem>>, vector<1x32x12xf32>
    %183 = vector.shape_cast %182 : vector<1x32x12xf32> to vector<32x12xf32>
    %cst_88 = arith.constant dense<0.000000e+00> : vector<32x256xf32>
    %184 = tpu.matmul %183, %181, %cst_88 {dimension_numbers = #tpu.dot_dimension_numbers<[1], [0], [0], [1], [0, 0, 1, 1], [], []>} : vector<32x12xf32>, vector<12x256xf32>, vector<32x256xf32> -> vector<32x256xf32>
    %185 = arith.addf %176, %184 : vector<32x256xf32>
    %186 = vector.extract_strided_slice %152 {offsets = [0, 17], sizes = [12, 256], strides = [1, 1]} : vector<12x290xf32> to vector<12x256xf32>
    %c4_89 = arith.constant 4 : index
    %c0_90 = arith.constant 0 : index
    %c0_91 = arith.constant 0 : index
    %187 = vector.load %arg3[%c4_89, %c0_90, %c0_91] : memref<9x32x12xf32, #tpu.memory_space<vmem>>, vector<1x32x12xf32>
    %188 = vector.shape_cast %187 : vector<1x32x12xf32> to vector<32x12xf32>
    %cst_92 = arith.constant dense<0.000000e+00> : vector<32x256xf32>
    %189 = tpu.matmul %188, %186, %cst_92 {dimension_numbers = #tpu.dot_dimension_numbers<[1], [0], [0], [1], [0, 0, 1, 1], [], []>} : vector<32x12xf32>, vector<12x256xf32>, vector<32x256xf32> -> vector<32x256xf32>
    %190 = arith.addf %185, %189 : vector<32x256xf32>
    %191 = vector.extract_strided_slice %152 {offsets = [0, 18], sizes = [12, 256], strides = [1, 1]} : vector<12x290xf32> to vector<12x256xf32>
    %cst_93 = arith.constant 0.000000e+00 : f32
    %192 = vector.shape_cast %34 : vector<1x256xi1> to vector<1x256xi1>
    %193 = vector.broadcast %192 : vector<1x256xi1> to vector<12x256xi1>
    %194 = vector.broadcast %cst_93 : f32 to vector<12x256xf32>
    %195 = arith.select %193, %191, %194 : vector<12x256xi1>, vector<12x256xf32>
    %c5_94 = arith.constant 5 : index
    %c0_95 = arith.constant 0 : index
    %c0_96 = arith.constant 0 : index
    %196 = vector.load %arg3[%c5_94, %c0_95, %c0_96] : memref<9x32x12xf32, #tpu.memory_space<vmem>>, vector<1x32x12xf32>
    %197 = vector.shape_cast %196 : vector<1x32x12xf32> to vector<32x12xf32>
    %cst_97 = arith.constant dense<0.000000e+00> : vector<32x256xf32>
    %198 = tpu.matmul %197, %195, %cst_97 {dimension_numbers = #tpu.dot_dimension_numbers<[1], [0], [0], [1], [0, 0, 1, 1], [], []>} : vector<32x12xf32>, vector<12x256xf32>, vector<32x256xf32> -> vector<32x256xf32>
    %199 = arith.addf %190, %198 : vector<32x256xf32>
    %200 = vector.extract_strided_slice %152 {offsets = [0, 32], sizes = [12, 256], strides = [1, 1]} : vector<12x290xf32> to vector<12x256xf32>
    %cst_98 = arith.constant 0.000000e+00 : f32
    %201 = vector.shape_cast %25 : vector<1x256xi1> to vector<1x256xi1>
    %202 = vector.broadcast %201 : vector<1x256xi1> to vector<12x256xi1>
    %203 = vector.broadcast %cst_98 : f32 to vector<12x256xf32>
    %204 = arith.select %202, %200, %203 : vector<12x256xi1>, vector<12x256xf32>
    %c6_99 = arith.constant 6 : index
    %c0_100 = arith.constant 0 : index
    %c0_101 = arith.constant 0 : index
    %205 = vector.load %arg3[%c6_99, %c0_100, %c0_101] : memref<9x32x12xf32, #tpu.memory_space<vmem>>, vector<1x32x12xf32>
    %206 = vector.shape_cast %205 : vector<1x32x12xf32> to vector<32x12xf32>
    %cst_102 = arith.constant dense<0.000000e+00> : vector<32x256xf32>
    %207 = tpu.matmul %206, %204, %cst_102 {dimension_numbers = #tpu.dot_dimension_numbers<[1], [0], [0], [1], [0, 0, 1, 1], [], []>} : vector<32x12xf32>, vector<12x256xf32>, vector<32x256xf32> -> vector<32x256xf32>
    %208 = arith.addf %199, %207 : vector<32x256xf32>
    %209 = vector.extract_strided_slice %152 {offsets = [0, 33], sizes = [12, 256], strides = [1, 1]} : vector<12x290xf32> to vector<12x256xf32>
    %c7_103 = arith.constant 7 : index
    %c0_104 = arith.constant 0 : index
    %c0_105 = arith.constant 0 : index
    %210 = vector.load %arg3[%c7_103, %c0_104, %c0_105] : memref<9x32x12xf32, #tpu.memory_space<vmem>>, vector<1x32x12xf32>
    %211 = vector.shape_cast %210 : vector<1x32x12xf32> to vector<32x12xf32>
    %cst_106 = arith.constant dense<0.000000e+00> : vector<32x256xf32>
    %212 = tpu.matmul %211, %209, %cst_106 {dimension_numbers = #tpu.dot_dimension_numbers<[1], [0], [0], [1], [0, 0, 1, 1], [], []>} : vector<32x12xf32>, vector<12x256xf32>, vector<32x256xf32> -> vector<32x256xf32>
    %213 = arith.addf %208, %212 : vector<32x256xf32>
    %214 = vector.extract_strided_slice %152 {offsets = [0, 34], sizes = [12, 256], strides = [1, 1]} : vector<12x290xf32> to vector<12x256xf32>
    %cst_107 = arith.constant 0.000000e+00 : f32
    %215 = vector.shape_cast %34 : vector<1x256xi1> to vector<1x256xi1>
    %216 = vector.broadcast %215 : vector<1x256xi1> to vector<12x256xi1>
    %217 = vector.broadcast %cst_107 : f32 to vector<12x256xf32>
    %218 = arith.select %216, %214, %217 : vector<12x256xi1>, vector<12x256xf32>
    %c8_108 = arith.constant 8 : index
    %c0_109 = arith.constant 0 : index
    %c0_110 = arith.constant 0 : index
    %219 = vector.load %arg3[%c8_108, %c0_109, %c0_110] : memref<9x32x12xf32, #tpu.memory_space<vmem>>, vector<1x32x12xf32>
    %220 = vector.shape_cast %219 : vector<1x32x12xf32> to vector<32x12xf32>
    %cst_111 = arith.constant dense<0.000000e+00> : vector<32x256xf32>
    %221 = tpu.matmul %220, %218, %cst_111 {dimension_numbers = #tpu.dot_dimension_numbers<[1], [0], [0], [1], [0, 0, 1, 1], [], []>} : vector<32x12xf32>, vector<12x256xf32>, vector<32x256xf32> -> vector<32x256xf32>
    %222 = arith.addf %213, %221 : vector<32x256xf32>
    %223 = vector.broadcast %35 : vector<32x1xf32> to vector<32x256xf32>
    %224 = arith.addf %222, %223 : vector<32x256xf32>
    %225 = vector.extract_strided_slice %224 {offsets = [0, 0], sizes = [8, 256], strides = [1, 1]} : vector<32x256xf32> to vector<8x256xf32>
    %226 = vector.extract_strided_slice %224 {offsets = [8, 0], sizes = [8, 256], strides = [1, 1]} : vector<32x256xf32> to vector<8x256xf32>
    %227 = vector.extract_strided_slice %224 {offsets = [16, 0], sizes = [8, 256], strides = [1, 1]} : vector<32x256xf32> to vector<8x256xf32>
    %228 = vector.extract_strided_slice %224 {offsets = [24, 0], sizes = [8, 256], strides = [1, 1]} : vector<32x256xf32> to vector<8x256xf32>
    %229 = arith.negf %225 : vector<8x256xf32>
    %230 = math.exp %229 : vector<8x256xf32>
    %cst_112 = arith.constant 1.000000e+00 : f32
    %231 = vector.broadcast %cst_112 : f32 to vector<8x256xf32>
    %232 = arith.addf %231, %230 : vector<8x256xf32>
    %233 = arith.divf %231, %232 : vector<8x256xf32>
    %cst_113 = arith.constant 1.000000e+00 : f32
    %234 = vector.broadcast %cst_113 : f32 to vector<8x256xf32>
    %235 = arith.addf %226, %234 : vector<8x256xf32>
    %236 = arith.negf %235 : vector<8x256xf32>
    %237 = math.exp %236 : vector<8x256xf32>
    %cst_114 = arith.constant 1.000000e+00 : f32
    %238 = vector.broadcast %cst_114 : f32 to vector<8x256xf32>
    %239 = arith.addf %238, %237 : vector<8x256xf32>
    %240 = arith.divf %238, %239 : vector<8x256xf32>
    %241 = arith.negf %227 : vector<8x256xf32>
    %242 = math.exp %241 : vector<8x256xf32>
    %cst_115 = arith.constant 1.000000e+00 : f32
    %243 = vector.broadcast %cst_115 : f32 to vector<8x256xf32>
    %244 = arith.addf %243, %242 : vector<8x256xf32>
    %245 = arith.divf %243, %244 : vector<8x256xf32>
    %246 = math.tanh %228 : vector<8x256xf32>
    %247 = arith.mulf %240, %150 : vector<8x256xf32>
    %248 = arith.mulf %233, %246 : vector<8x256xf32>
    %249 = arith.addf %247, %248 : vector<8x256xf32>
    %250 = math.tanh %249 : vector<8x256xf32>
    %251 = arith.mulf %245, %250 : vector<8x256xf32>
    %c1_116 = arith.constant 1 : index
    %c0_117 = arith.constant 0 : index
    %c0_118 = arith.constant 0 : index
    %252 = vector.load %arg6[%c1_116, %c0_117, %c0_118] : memref<2x16x256xf32, #tpu.memory_space<vmem>>, vector<1x8x256xf32>
    %253 = vector.shape_cast %252 : vector<1x8x256xf32> to vector<8x256xf32>
    %254 = vector.shape_cast %251 : vector<8x256xf32> to vector<1x8x256xf32>
    tpu.vector_store %arg6[%c1_116, %c0_117, %c0_118], %254 {strides = array<i32>} : memref<2x16x256xf32, #tpu.memory_space<vmem>>, vector<1x8x256xf32>,
    %c1_119 = arith.constant 1 : index
    %c8_120 = arith.constant 8 : index
    %c0_121 = arith.constant 0 : index
    %255 = vector.load %arg6[%c1_119, %c8_120, %c0_121] : memref<2x16x256xf32, #tpu.memory_space<vmem>>, vector<1x8x256xf32>
    %256 = vector.shape_cast %255 : vector<1x8x256xf32> to vector<8x256xf32>
    %257 = vector.shape_cast %249 : vector<8x256xf32> to vector<1x8x256xf32>
    tpu.vector_store %arg6[%c1_119, %c8_120, %c0_121], %257 {strides = array<i32>} : memref<2x16x256xf32, #tpu.memory_space<vmem>>, vector<1x8x256xf32>,
    return
  }
  func.func @transform_0(%arg0: i32) -> (i32, i32, i32) {
    %c0_i32 = arith.constant 0 : i32
    %c0_i32_0 = arith.constant 0 : i32
    %c0_i32_1 = arith.constant 0 : i32
    return %arg0, %c0_i32, %c0_i32_0 : i32, i32, i32
  }
  func.func @transform_1(%arg0: i32) -> (i32, i32, i32) {
    %c0_i32 = arith.constant 0 : i32
    %c0_i32_0 = arith.constant 0 : i32
    %c0_i32_1 = arith.constant 0 : i32
    return %arg0, %c0_i32, %c0_i32_0 : i32, i32, i32
  }
  func.func @transform_2(%arg0: i32) -> (i32, i32, i32) {
    %c0_i32 = arith.constant 0 : i32
    %c0_i32_0 = arith.constant 0 : i32
    %c0_i32_1 = arith.constant 0 : i32
    %c0_i32_2 = arith.constant 0 : i32
    return %c0_i32, %c0_i32_0, %c0_i32_1 : i32, i32, i32
  }
  func.func @transform_3(%arg0: i32) -> (i32, i32) {
    %c0_i32 = arith.constant 0 : i32
    %c0_i32_0 = arith.constant 0 : i32
    %c0_i32_1 = arith.constant 0 : i32
    return %c0_i32, %c0_i32_0 : i32, i32
  }
  func.func @transform_4(%arg0: i32) -> (i32, i32, i32) {
    %c0_i32 = arith.constant 0 : i32
    %c0_i32_0 = arith.constant 0 : i32
    %c0_i32_1 = arith.constant 0 : i32
    %c0_i32_2 = arith.constant 0 : i32
    return %c0_i32, %c0_i32_0, %c0_i32_1 : i32, i32, i32
  }
  func.func @transform_5(%arg0: i32) -> (i32, i32, i32) {
    %c0_i32 = arith.constant 0 : i32
    %c0_i32_0 = arith.constant 0 : i32
    %c0_i32_1 = arith.constant 0 : i32
    return %arg0, %c0_i32, %c0_i32_0 : i32, i32, i32
  }
}

</mosaic_0001>

<bundles_post_ra>
// kernel: tpu_custom_call.1
= control target key start
LH: loop header
LB: loop body
LE: loop exit
PB: predicated region body
PF: predicated region fallthrough
CT: control target
= control target key end

     0   :  { %s2802_s22 = smov 17   ;;  %s4300_s0 = inlined_call_operand.vmem [shape: f32[2,12,256], index: 0, kind: input, shape index: {}]   ;;  %s4301_s1 = inlined_call_operand.vmem [shape: f32[2,8,256], index: 1, kind: input, shape index: {}]   ;;  %s4302_s2 = inlined_call_operand.vmem [shape: f32[9,32,12], index: 2, kind: input, shape index: {}]   ;;  %s4303_s3 = inlined_call_operand.vmem [shape: f32[32,1], index: 3, kind: input, shape index: {}]   ;;  %s4304_s4 = inlined_call_operand.vmem [shape: f32[3,8,1], index: 4, kind: input, shape index: {}]   ;;  %s4305_s5 = inlined_call_operand.hbm [shape: f32[2,16,256], index: 5, kind: output, shape index: {}]  }
   0x1   :  { %v70_v0 = vld [vmem:[%s4300_s0 + $0x10] sm:$0xf]  ;;  %v68_v1 = vld [vmem:[%s4300_s0] sm:$0xff] }
   0x2   :  { %82 = vrot.lane.b32.xlu0 %v70_v0, %s2802_s22  ;;  %78 = vrot.lane.b32.xlu1 %v68_v1, %s2802_s22 }
   0x3   :  { %10 = vsyncpa [#allocation3], 0  ;;  %v71_v2 = vld [vmem:[%s4300_s0 + $0x18] sm:$0xf]  ;;  %v69_v3 = vld [vmem:[%s4300_s0 + $0x8] sm:$0xff]  ;;  %v21_v4 = vlaneseq  ;;  %vm86_vm0 = vcmask 138240  }
   0x4   :  { %vm152_vm2 = vcmask 1043456   ;;  %s2803_s26 = smov 127   ;;  %s2804_s27 = smov 112   ;;  %v2523_v24 = vld [vmem:[%s4300_s0 + $0x38] sm:$0xf]  ;;  %v2520_v25 = vld [vmem:[%s4300_s0 + $0x20] sm:$0xff] }
   0x5   :  { %v2861_v5 = vand.u32 127, %v21_v4  ;;  %s2805_s28 = smov 126   ;;  %s2806_s29 = smov 110   ;;  %v2522_v26 = vld [vmem:[%s4300_s0 + $0x30] sm:$0xf]  ;;  %v2521_v27 = vld [vmem:[%s4300_s0 + $0x28] sm:$0xff] }
   0x6   :  { %s2807_s30 = smov 111   ;;  %s2808_s14 = smov 95   ;;  %vm132_vm4 = vcmask 1039360   ;;  %v2994_v30 = vld [vmem:[%s4302_s2] sm:$0xff]  ;;  %vm139_vm5 = vcmask 97280   ;;  %v3011_v33 = vld [vmem:[%s4302_s2 + $0x8] sm:$0xff] }
   0x7   :  { %v28_v6 = vand.u32 15, %v2861_v5  ;;  %v2869_v8 = vadd.s32 128, %v2861_v5  ;;  %s2809_s16 = smov 96   ;;  %v3026_v35 = vld [vmem:[%s4302_s2 + $0x10] sm:$0xff]  ;;  %v3035_v38 = vld [vmem:[%s4302_s2 + $0x18] sm:$0xff]  ;;  %v3046_v43 = vld [vmem:[%s4302_s2 + $0x20] sm:$0xff] }
   0x8   :  { %vm421_vm6 = vcmask 916480   ;;  %v3063_v53 = vld [vmem:[%s4302_s2 + $0x28] sm:$0xff]  ;;  %v3074_v57 = vld [vmem:[%s4302_s2 + $0x60] sm:$0xff]  ;;  %v3085_v60 = vld [vmem:[%s4302_s2 + $0x30] sm:$0xff]  ;;  %vm307_vm7 = vcmask 1031168   ;;  %vm641_vm10 = vcmask 900096  }
   0x9   :  { %v2866_v7 = vadd.s32 4294967295, %v28_v6  ;;  %v35_v9 = vand.u32 15, %v2869_v8  ;;  %v3089_v61 = vadd.s32 1, %v28_v6  ;;  %v3110_v4 = vld [vmem:[%s4302_s2 + $0x68] sm:$0xff]  ;;  %v3119_v8 = vld [vmem:[%s4302_s2 + $0x38] sm:$0xff]  ;;  %vm540_vm11 = vcmask 908288  }
   0xa   :  { %84 = vrot.lane.b32.xlu0 %v71_v2, %s2802_s22  ;;  %80 = vrot.lane.b32.xlu1 %v69_v3, %s2802_s22  ;;  %s2810_s12 = smov 94   ;;  %vm874_vm12 = vcmask 777216   ;;  %vm755_vm13 = vcmask 785408   ;;  %vm975_vm14 = vcmask 769024  }
   0xb   :  { %vm50_vm1 = vcmp.ge.s32.totalorder %v2866_v7, 0  ;;  %v2884_v14 = vadd.s32 4294967295, %v35_v9  ;;  %v3093_v62 = vadd.s32 1, %v35_v9  ;;  %vm60_vm8 = vcmp.lt.s32.totalorder %v3089_v61, 16 }
   0xd   :  { %vm51_vm3 = vcmp.ge.s32.totalorder %v2884_v14, 0  ;;  %vm61_vm9 = vcmp.lt.s32.totalorder %v3093_v62, 16 }
  0x74   :  { %v83_v10 = vpop.permute.xlu0 %82  ;;  %v79_v11 = vpop.permute.xlu1 %78 }
  0x75   :  { %v2874_v12 = vsel %vm86_vm0, 0.0, %v83_v10  ;;  %v2887_v15 = vsel %vm86_vm0, 0.0, %v79_v11 }
  0x76   :  { %126 = vrot.lane.b32.xlu2 %v2874_v12, %s2803_s26  ;;  %v105_v13 = vsel %vm50_vm1, %v2874_v12, 0.0 }
  0x77   :  { %2394 = vmatpush.msk.msra.mxu2 %vm152_vm2, %v105_v13 }
  0x79   :  { %2395 = vmatpush.msk.msra.mxu2 %vm50_vm1, %v2887_v15 }
  0x7a   :  { %2396 = vmatmul.msk.f32.vlgmr.msra.gmra.mxu2 %vm139_vm5, %v2994_v30 }
  0x7c   :  { %v85_v16 = vpop.permute.xlu0 %84  ;;  %v81_v17 = vpop.permute.xlu1 %80 }
  0x7d   :  { %v2894_v18 = vsel %vm86_vm0, %v83_v10, %v85_v16  ;;  %v2897_v19 = vsel %vm86_vm0, %v85_v16, 0.0  ;;  %v2900_v20 = vsel %vm86_vm0, %v79_v11, %v81_v17  ;;  %v2917_v23 = vsel %vm86_vm0, %v81_v17, 0.0  ;;  %v3136_v17 = vld [vmem:[%s4302_s2 + $0x70] sm:$0xff] }
  0x7e   :  { %130 = vrot.lane.b32.xlu0 %v2897_v19, %s2803_s26  ;;  %128 = vrot.lane.b32.xlu2 %v2894_v18, %s2803_s26  ;;  %v106_v21 = vsel %vm51_vm3, %v2894_v18, 0.0  ;;  %v2679_v22 = vpack.i.bf16 %v2900_v20, %v2887_v15 }
  0x7f   :  { %2400 = vmatpush.msk.msra.mxu3 %vm152_vm2, %v106_v21  ;;  %v3145_v21 = vld [vmem:[%s4302_s2 + $0x40] sm:$0xff] }
  0x80   :  { %2680 = vrot.lane.b32.xlu1 %v2679_v22, %s2803_s26 }
  0x81   :  { %2401 = vmatpush.msk.msra.mxu3 %vm51_vm3, %v2900_v20 }
  0x82   :  { %2402 = vmatmul.msk.f32.vlgmr.msra.gmra.mxu3 %vm139_vm5, %v2994_v30  ;;  %2397 = vmatmul.msk.f32.gmra.mxu2 %vm139_vm5, %v3011_v33 }
  0x86   :  { %415 = vrot.lane.b32.xlu0 %v2874_v12, %s2804_s27  ;;  %124 = vrot.lane.b32.xlu2 %v2917_v23, %s2803_s26 }
  0x88   :  { %417 = vrot.lane.b32.xlu1 %v2894_v18, %s2804_s27 }
  0x8a   :  { %2403 = vmatmul.msk.f32.gmra.mxu3 %vm139_vm5, %v3011_v33  ;;  %2398 = vmatmul.msk.f32.gmra.mxu2 %vm139_vm5, %v3026_v35 }
  0x8e   :  { %409 = vrot.lane.b32.xlu0 %v2887_v15, %s2804_s27  ;;  %419 = vrot.lane.b32.xlu2 %v2897_v19, %s2804_s27 }
  0x90   :  { %411 = vrot.lane.b32.xlu1 %v2900_v20, %s2804_s27 }
  0x92   :  { %2404 = vmatmul.msk.f32.gmra.mxu3 %vm139_vm5, %v3026_v35  ;;  %2399 = vmatmul.msk.f32.gmra.mxu2 %vm139_vm5, %v3035_v38 }
  0x96   :  { %301 = vrot.lane.b32.xlu0 %v2874_v12, %s2805_s28  ;;  %413 = vrot.lane.b32.xlu2 %v2917_v23, %s2804_s27 }
  0x98   :  { %303 = vrot.lane.b32.xlu1 %v2894_v18, %s2805_s28 }
  0x9a   :  { %2405 = vmatmul.msk.f32.gmra.mxu3 %vm139_vm5, %v3035_v38 }
  0x9e   :  { %295 = vrot.lane.b32.xlu0 %v2887_v15, %s2805_s28  ;;  %305 = vrot.lane.b32.xlu2 %v2897_v19, %s2805_s28 }
  0xa0   :  { %297 = vrot.lane.b32.xlu1 %v2900_v20, %s2805_s28 }
  0xa6   :  { %635 = vrot.lane.b32.xlu0 %v2874_v12, %s2806_s29  ;;  %299 = vrot.lane.b32.xlu2 %v2917_v23, %s2805_s28 }
  0xa8   :  { %637 = vrot.lane.b32.xlu1 %v2894_v18, %s2806_s29 }
  0xae   :  { %629 = vrot.lane.b32.xlu0 %v2887_v15, %s2806_s29  ;;  %639 = vrot.lane.b32.xlu2 %v2897_v19, %s2806_s29 }
  0xb0   :  { %631 = vrot.lane.b32.xlu1 %v2900_v20, %s2806_s29 }
  0xb6   :  { %534 = vrot.lane.b32.xlu0 %v2874_v12, %s2807_s30  ;;  %633 = vrot.lane.b32.xlu2 %v2917_v23, %s2806_s29 }
  0xb8   :  { %536 = vrot.lane.b32.xlu1 %v2894_v18, %s2807_s30 }
  0xbe   :  { %1255 = vrot.lane.b32.xlu0 %v2523_v24, %s2802_s22  ;;  %538 = vrot.lane.b32.xlu2 %v2897_v19, %s2807_s30 }
  0xc0   :  { %1249 = vrot.lane.b32.xlu1 %v2520_v25, %s2802_s22 }
  0xc6   :  { %1253 = vrot.lane.b32.xlu2 %v2522_v26, %s2802_s22  ;;  %2685 = vrot.lane.b32.xlu0 %v2679_v22, %s2807_s30 }
  0xc8   :  { %532 = vrot.lane.b32.xlu1 %v2917_v23, %s2807_s30 }
  0xce   :  { %1251 = vrot.lane.b32.xlu2 %v2521_v27, %s2802_s22  ;;  %868 = vrot.lane.b32.xlu0 %v2874_v12, %s2808_s14 }
  0xd0   :  { %v127_v28 = vpop.permute.xlu2 %126  ;;  %870 = vrot.lane.b32.xlu1 %v2894_v18, %s2808_s14 }
  0xd6   :  { %872 = vrot.lane.b32.xlu2 %v2897_v19, %s2808_s14  ;;  %2690 = vrot.lane.b32.xlu0 %v2679_v22, %s2808_s14 }
  0xd8   :  { %v129_v29 = vpop.permute.xlu2 %128  ;;  %866 = vrot.lane.b32.xlu1 %v2917_v23, %s2808_s14 }
  0xd9   :  { %v135_v31 = vsel %vm132_vm4, %v127_v28, %v129_v29  ;;  %v3160_v28 = vld [vmem:[%s4302_s2 + $0x78] sm:$0xff] }
  0xda   :  { %2384 = vmatpush.msk.msra.mxu0 %vm152_vm2, %v135_v31 }
  0xde   :  { %749 = vrot.lane.b32.xlu2 %v2874_v12, %s2809_s16  ;;  %751 = vrot.lane.b32.xlu0 %v2894_v18, %s2809_s16 }
  0xe0   :  { %v125_v32 = vpop.permute.xlu2 %124  ;;  %753 = vrot.lane.b32.xlu1 %v2897_v19, %s2809_s16 }
  0xe6   :  { %743 = vrot.lane.b32.xlu2 %v2887_v15, %s2809_s16  ;;  %745 = vrot.lane.b32.xlu0 %v2900_v20, %s2809_s16 }
  0xe8   :  { %v420_v34 = vpop.permute.xlu2 %419  ;;  %747 = vrot.lane.b32.xlu1 %v2917_v23, %s2809_s16 }
  0xf0   :  { %v131_v36 = vpop.permute.xlu0 %130  ;;  %v414_v37 = vpop.permute.xlu2 %413 }
  0xf1   :  { %v136_v39 = vsel %vm132_vm4, %v129_v29, %v131_v36 }
  0xf2   :  { %2389 = vmatpush.msk.msra.mxu1 %vm152_vm2, %v136_v39  ;;  %v2681_v40 = vpop.permute.xlu1 %2680 }
  0xf3   :  { %v2683_v41 = vunpack.i.h.bf16 %v2681_v40  ;;  %v2682_v42 = vunpack.i.l.bf16 %v2681_v40 }
  0xf5   :  { %v134_v44 = vsel %vm132_vm4, %v2683_v41, %v125_v32  ;;  %v133_v45 = vsel %vm132_vm4, %v2682_v42, %v2683_v41  ;;  %v3169_v32 = vld [vmem:[%s4302_s2 + $0x48] sm:$0xff]  ;;  %v3191_v42 = vld [vmem:[%s4302_s2 + $0xa0] sm:$0xff] }
  0xf6   :  { %201 = vmatpush.msra.mxu1 %v134_v44  ;;  %172 = vmatpush.msra.mxu0 %v133_v45  ;;  %v3200_v44 = vld [vmem:[%s4302_s2 + $0x50] sm:$0xff] }
  0xf7   :  { %2385 = vmatmul.msk.f32.vlgmr.msra.gmra.mxu0 %vm139_vm5, %v3046_v43  ;;  %2390 = vmatmul.msk.f32.vlgmr.msra.gmra.mxu1 %vm139_vm5, %v3046_v43 }
  0xf8   :  { %v416_v46 = vpop.permute.xlu0 %415  ;;  %v306_v47 = vpop.permute.xlu2 %305 }
  0xfa   :  { %v418_v48 = vpop.permute.xlu1 %417 }
  0xfb   :  { %v424_v49 = vsel %vm421_vm6, %v416_v46, %v418_v48  ;;  %v425_v50 = vsel %vm421_vm6, %v418_v48, %v420_v34 }
  0xfc   :  { %v432_v51 = vsel %vm50_vm1, %v424_v49, 0.0  ;;  %v433_v52 = vsel %vm51_vm3, %v425_v50, 0.0  ;;  %v3215_v49 = vld [vmem:[%s4302_s2 + $0xa8] sm:$0xff]  ;;  %v3222_v50 = vld [vmem:[%s4302_s2 + $0x58] sm:$0xff] }
  0xfd   :  { %2426 = vmatpush.msk.msrb.mxu2 %vm152_vm2, %v432_v51  ;;  %2432 = vmatpush.msk.msrb.mxu3 %vm152_vm2, %v433_v52 }
  0xff   :  { %2386 = vmatmul.msk.f32.gmra.mxu0 %vm139_vm5, %v3063_v53  ;;  %2391 = vmatmul.msk.f32.gmra.mxu1 %vm139_vm5, %v3063_v53 }
 0x100   :  { %v410_v54 = vpop.permute.xlu0 %409  ;;  %v300_v55 = vpop.permute.xlu2 %299 }
 0x102   :  { %v412_v56 = vpop.permute.xlu1 %411 }
 0x103   :  { %v422_v58 = vsel %vm421_vm6, %v410_v54, %v412_v56  ;;  %v423_v59 = vsel %vm421_vm6, %v412_v56, %v414_v37 }
 0x104   :  { %2427 = vmatpush.msk.msrb.mxu2 %vm50_vm1, %v422_v58  ;;  %2433 = vmatpush.msk.msrb.mxu3 %vm51_vm3, %v423_v59 }
 0x105   :  { %2428 = vmatmul.msk.f32.vlgmr.msrb.gmra.mxu2 %vm139_vm5, %v3074_v57  ;;  %2434 = vmatmul.msk.f32.vlgmr.msrb.gmra.mxu3 %vm139_vm5, %v3074_v57 }
 0x107   :  { %2387 = vmatmul.msk.f32.gmra.mxu0 %vm139_vm5, %v3085_v60  ;;  %2392 = vmatmul.msk.f32.gmra.mxu1 %vm139_vm5, %v3085_v60 }
 0x108   :  { %v302_v63 = vpop.permute.xlu0 %301  ;;  %v640_v0 = vpop.permute.xlu2 %639 }
 0x10a   :  { %v304_v1 = vpop.permute.xlu1 %303 }
 0x10b   :  { %v310_v2 = vsel %vm307_vm7, %v302_v63, %v304_v1  ;;  %v311_v3 = vsel %vm307_vm7, %v304_v1, %v306_v47  ;;  %v3251_v63 = vld [vmem:[%s4302_s2 + $0xb0] sm:$0xff] }
 0x10c   :  { %v318_v5 = vsel %vm60_vm8, %v310_v2, 0.0  ;;  %v319_v6 = vsel %vm61_vm9, %v311_v3, 0.0 }
 0x10d   :  { %2410 = vmatpush.msk.msrb.mxu0 %vm152_vm2, %v318_v5  ;;  %2416 = vmatpush.msk.msrb.mxu1 %vm152_vm2, %v319_v6 }
 0x10e   :  { %2429 = vmatmul.msk.f32.gmra.mxu2 %vm139_vm5, %v3110_v4  ;;  %2435 = vmatmul.msk.f32.gmra.mxu3 %vm139_vm5, %v3110_v4 }
 0x10f   :  { %2388 = vmatmul.msk.f32.gmra.mxu0 %vm139_vm5, %v3119_v8  ;;  %2393 = vmatmul.msk.f32.gmra.mxu1 %vm139_vm5, %v3119_v8 }
 0x110   :  { %v296_v9 = vpop.permute.xlu0 %295  ;;  %v634_v10 = vpop.permute.xlu2 %633 }
 0x112   :  { %v298_v11 = vpop.permute.xlu1 %297 }
 0x113   :  { %v308_v13 = vsel %vm307_vm7, %v296_v9, %v298_v11  ;;  %v309_v16 = vsel %vm307_vm7, %v298_v11, %v300_v55  ;;  %v3273_v9 = vld [vmem:[%s4302_s2 + $0x80] sm:$0xff] }
 0x114   :  { %2411 = vmatpush.msk.msrb.mxu0 %vm60_vm8, %v308_v13  ;;  %2417 = vmatpush.msk.msrb.mxu1 %vm61_vm9, %v309_v16  ;;  %v3280_v13 = vld [vmem:[%s4302_s2 + $0xb8] sm:$0xff] }
 0x115   :  { %4314 = vst [vmem:[#allocation5_spill] sm:$0xff] %v3280_v13 }
 0x116   :  { %2430 = vmatmul.msk.f32.gmra.mxu2 %vm139_vm5, %v3136_v17  ;;  %2436 = vmatmul.msk.f32.gmra.mxu3 %vm139_vm5, %v3136_v17 }
 0x117   :  { %2412 = vmatmul.msk.f32.vlgmr.msrb.gmra.mxu0 %vm139_vm5, %v3145_v21  ;;  %2418 = vmatmul.msk.f32.vlgmr.msrb.gmra.mxu1 %vm139_vm5, %v3145_v21 }
 0x118   :  { %v636_v22 = vpop.permute.xlu0 %635  ;;  %v539_v24 = vpop.permute.xlu2 %538 }
 0x11a   :  { %v638_v25 = vpop.permute.xlu1 %637 }
 0x11b   :  { %v644_v26 = vsel %vm641_vm10, %v636_v22, %v638_v25  ;;  %v645_v27 = vsel %vm641_vm10, %v638_v25, %v640_v0 }
 0x11c   :  { %v652_v29 = vsel %vm60_vm8, %v644_v26, 0.0  ;;  %v653_v31 = vsel %vm61_vm9, %v645_v27, 0.0 }
 0x11d   :  { %2456 = vmatpush.msk.msra.mxu2 %vm152_vm2, %v652_v29  ;;  %2462 = vmatpush.msk.msra.mxu3 %vm152_vm2, %v653_v31  ;;  %v3318_v29 = vld [vmem:[%s4302_s2 + $0x90] sm:$0xff] }
 0x11e   :  { %2431 = vmatmul.msk.f32.gmra.mxu2 %vm139_vm5, %v3160_v28  ;;  %2437 = vmatmul.msk.f32.gmra.mxu3 %vm139_vm5, %v3160_v28 }
 0x11f   :  { %2413 = vmatmul.msk.f32.gmra.mxu0 %vm139_vm5, %v3169_v32  ;;  %2419 = vmatmul.msk.f32.gmra.mxu1 %vm139_vm5, %v3169_v32 }
 0x120   :  { %v630_v34 = vpop.permute.xlu0 %629  ;;  %v1254_v36 = vpop.permute.xlu2 %1253 }
 0x121   :  { %v3182_v37 = vsel %vm86_vm0, 0.0, %v1254_v36 }
 0x122   :  { %v632_v39 = vpop.permute.xlu1 %631  ;;  %1291 = vrot.lane.b32.xlu2 %v3182_v37, %s2803_s26 }
 0x123   :  { %v642_v40 = vsel %vm641_vm10, %v630_v34, %v632_v39  ;;  %v643_v41 = vsel %vm641_vm10, %v632_v39, %v634_v10 }
 0x124   :  { %2457 = vmatpush.msk.msra.mxu2 %vm60_vm8, %v642_v40  ;;  %2463 = vmatpush.msk.msra.mxu3 %vm61_vm9, %v643_v41 }
 0x126   :  { %2458 = vmatmul.msk.f32.vlgmr.msra.gmra.mxu2 %vm139_vm5, %v3191_v42  ;;  %2464 = vmatmul.msk.f32.vlgmr.msra.gmra.mxu3 %vm139_vm5, %v3191_v42 }
 0x127   :  { %2414 = vmatmul.msk.f32.gmra.mxu0 %vm139_vm5, %v3200_v44  ;;  %2420 = vmatmul.msk.f32.gmra.mxu1 %vm139_vm5, %v3200_v44 }
 0x128   :  { %v535_v45 = vpop.permute.xlu0 %534  ;;  %v1252_v55 = vpop.permute.xlu2 %1251 }
 0x129   :  { %v3262_v1 = vsel %vm86_vm0, %v1252_v55, 0.0 }
 0x12a   :  { %v537_v46 = vpop.permute.xlu1 %536 }
 0x12b   :  { %v543_v47 = vsel %vm540_vm11, %v535_v45, %v537_v46  ;;  %v544_v48 = vsel %vm540_vm11, %v537_v46, %v539_v24  ;;  %v3347_v45 = vld [vmem:[%s4302_s2 + $0x98] sm:$0xff] }
 0x12c   :  { %2442 = vmatpush.msk.msra.mxu0 %vm152_vm2, %v543_v47  ;;  %2447 = vmatpush.msk.msra.mxu1 %vm152_vm2, %v544_v48  ;;  %v3356_v48 = vld [vmem:[%s4302_s2 + $0xe8] sm:$0xff] }
 0x12d   :  { %4316 = vst [vmem:[#allocation7_spill] sm:$0xff] %v3356_v48 }
 0x12e   :  { %2459 = vmatmul.msk.f32.gmra.mxu2 %vm139_vm5, %v3215_v49  ;;  %2465 = vmatmul.msk.f32.gmra.mxu3 %vm139_vm5, %v3215_v49 }
 0x12f   :  { %2415 = vmatmul.msk.f32.gmra.mxu0 %vm139_vm5, %v3222_v50  ;;  %2421 = vmatmul.msk.f32.gmra.mxu1 %vm139_vm5, %v3222_v50 }
 0x130   :  { %v1256_v51 = vpop.permute.xlu0 %1255  ;;  %v873_v16 = vpop.permute.xlu2 %872 }
 0x131   :  { %v3233_v52 = vsel %vm86_vm0, %v1254_v36, %v1256_v51  ;;  %v3236_v54 = vsel %vm86_vm0, %v1256_v51, 0.0 }
 0x132   :  { %1293 = vrot.lane.b32.xlu0 %v3233_v52, %s2803_s26  ;;  %1295 = vrot.lane.b32.xlu1 %v3236_v54, %s2803_s26  ;;  %v1250_v56 = vpop.permute.xlu1 %1249 }
 0x133   :  { %v3243_v58 = vsel %vm86_vm0, %v1250_v56, %v1252_v55  ;;  %v3246_v59 = vsel %vm86_vm0, 0.0, %v1250_v56 }
 0x134   :  { %v3255_v0 = vpack.i.bf16 %v3243_v58, %v3246_v59 }
 0x136   :  { %2695 = vrot.lane.b32.xlu2 %v3255_v0, %s2803_s26  ;;  %2460 = vmatmul.msk.f32.gmra.mxu2 %vm139_vm5, %v3251_v63 }
 0x137   :  { %2466 = vmatmul.msk.f32.gmra.mxu3 %vm139_vm5, %v3251_v63 }
 0x138   :  { %v2686_v2 = vpop.permute.xlu0 %2685 }
 0x139   :  { %v2688_v3 = vunpack.i.h.bf16 %v2686_v2  ;;  %v2687_v5 = vunpack.i.l.bf16 %v2686_v2 }
 0x13a   :  { %1289 = vrot.lane.b32.xlu0 %v3262_v1, %s2803_s26  ;;  %969 = vrot.lane.b32.xlu1 %v2874_v12, %s2810_s12  ;;  %v533_v6 = vpop.permute.xlu1 %532 }
 0x13b   :  { %v541_v10 = vsel %vm540_vm11, %v2687_v5, %v2688_v3  ;;  %v542_v11 = vsel %vm540_vm11, %v2688_v3, %v533_v6  ;;  %v3377_v3 = vld [vmem:[%s4302_s2 + $0xc0] sm:$0xff]  ;;  %v3387_v6 = vld [vmem:[%s4302_s2 + $0xf0] sm:$0xff] }
 0x13c   :  { %578 = vmatpush.msra.mxu0 %v541_v10  ;;  %607 = vmatpush.msra.mxu1 %v542_v11  ;;  %4317 = vst [vmem:[#allocation8_spill] sm:$0xff] %v3387_v6  ;;  %v3406_v10 = vld [vmem:[%s4302_s2 + $0xc8] sm:$0xff]  ;;  %v2487_v11 = vld [vmem:[%s4302_s2 + $0xf8] sm:$0xff] }
 0x13d   :  { %2443 = vmatmul.msk.f32.vlgmr.msra.gmra.mxu0 %vm139_vm5, %v3273_v9  ;;  %2448 = vmatmul.msk.f32.vlgmr.msra.gmra.mxu1 %vm139_vm5, %v3273_v9 }
 0x13e   :  { %971 = vrot.lane.b32.xlu2 %v2894_v18, %s2810_s12  ;;  %2461 = vmatmul.msk.f32.gmra.mxu2 %vm139_vm5, %v3280_v13  ;;  %v3299_v18 = vld [vmem:[%s4302_s2 + $0x88] sm:$0xff] }
 0x13f   :  { %2467 = vmatmul.msk.f32.gmra.mxu3 %vm139_vm5, %v3280_v13 }
 0x140   :  { %v869_v12 = vpop.permute.xlu0 %868 }
 0x142   :  { %973 = vrot.lane.b32.xlu0 %v2897_v19, %s2810_s12  ;;  %963 = vrot.lane.b32.xlu1 %v2887_v15, %s2810_s12  ;;  %v871_v22 = vpop.permute.xlu1 %870 }
 0x143   :  { %v877_v24 = vsel %vm874_vm12, %v869_v12, %v871_v22  ;;  %v878_v25 = vsel %vm874_vm12, %v871_v22, %v873_v16  ;;  %v3426_v12 = vld [vmem:[%s4302_s2 + $0xd0] sm:$0xff]  ;;  %v3428_v16 = vpop.f32.mrf.mxu2  ;;  %v3430_v22 = vpop.f32.mrf.mxu3 }
 0x144   :  { %2488 = vmatpush.msk.msrb.mxu2 %vm152_vm2, %v877_v24  ;;  %2493 = vmatpush.msk.msrb.mxu3 %vm152_vm2, %v878_v25  ;;  %v3445_v24 = vld [vmem:[%s4302_s2 + $0xd8] sm:$0xff] }
 0x145   :  { %2444 = vmatmul.msk.f32.gmra.mxu0 %vm139_vm5, %v3299_v18  ;;  %2449 = vmatmul.msk.f32.gmra.mxu1 %vm139_vm5, %v3299_v18 }
 0x146   :  { %965 = vrot.lane.b32.xlu2 %v2900_v20, %s2810_s12  ;;  %v3325_v20 = vld [vmem:[%s4302_s2 + $0xe0] sm:$0xff] }
 0x147   :  { %4315 = vst [vmem:[#allocation6_spill] sm:$0xff] %v3325_v20 }
 0x148   :  { %v2691_v15 = vpop.permute.xlu0 %2690 }
 0x149   :  { %v2693_v19 = vunpack.i.h.bf16 %v2691_v15  ;;  %v2692_v26 = vunpack.i.l.bf16 %v2691_v15 }
 0x14a   :  { %967 = vrot.lane.b32.xlu0 %v2917_v23, %s2810_s12  ;;  %1459 = vrot.lane.b32.xlu1 %v3182_v37, %s2805_s28  ;;  %v867_v27 = vpop.permute.xlu1 %866  ;;  %v750_v23 = vpop.permute.xlu2 %749 }
 0x14b   :  { %v875_v31 = vsel %vm874_vm12, %v2692_v26, %v2693_v19  ;;  %v876_v34 = vsel %vm874_vm12, %v2693_v19, %v867_v27  ;;  %v3453_v19 = vpop.f32.mrf.mxu2  ;;  %v3455_v26 = vpop.f32.mrf.mxu3 }
 0x14c   :  { %912 = vmatpush.msrb.mxu2 %v875_v31  ;;  %941 = vmatpush.msrb.mxu3 %v876_v34  ;;  %4318 = vst [vmem:[#allocation9_spill] sm:$0xff] %v3455_v26 }
 0x14d   :  { %2445 = vmatmul.msk.f32.gmra.mxu0 %vm139_vm5, %v3318_v29  ;;  %2450 = vmatmul.msk.f32.gmra.mxu1 %vm139_vm5, %v3318_v29 }
 0x14e   :  { %1461 = vrot.lane.b32.xlu2 %v3233_v52, %s2805_s28  ;;  %2489 = vmatmul.msk.f32.vlgmr.msrb.gmra.mxu2 %vm139_vm5, %v3325_v20 }
 0x14f   :  { %2494 = vmatmul.msk.f32.vlgmr.msrb.gmra.mxu3 %vm139_vm5, %v3325_v20 }
 0x150   :  { %v752_v36 = vpop.permute.xlu0 %751 }
 0x151   :  { %v758_v39 = vsel %vm755_vm13, %v750_v23, %v752_v36 }
 0x152   :  { %v766_v40 = vsel %vm50_vm1, %v758_v39, 0.0  ;;  %1463 = vrot.lane.b32.xlu0 %v3236_v54, %s2805_s28  ;;  %1453 = vrot.lane.b32.xlu1 %v3246_v59, %s2805_s28  ;;  %v754_v41 = vpop.permute.xlu1 %753  ;;  %v744_v51 = vpop.permute.xlu2 %743 }
 0x153   :  { %v759_v46 = vsel %vm755_vm13, %v752_v36, %v754_v41  ;;  %2472 = vmatpush.msk.msrb.mxu0 %vm152_vm2, %v766_v40  ;;  %v3471_v34 = vpop.f32.mrf.mxu2  ;;  %v3473_v23 = vpop.f32.mrf.mxu3 }
 0x154   :  { %v767_v47 = vsel %vm51_vm3, %v759_v46, 0.0  ;;  %4319 = vst [vmem:[#allocation10_spill] sm:$0xff] %v3471_v34 }
 0x155   :  { %2478 = vmatpush.msk.msrb.mxu1 %vm152_vm2, %v767_v47  ;;  %2446 = vmatmul.msk.f32.gmra.mxu0 %vm139_vm5, %v3347_v45  ;;  %4320 = vst [vmem:[#allocation11_spill] sm:$0xff] %v3473_v23 }
 0x156   :  { %1455 = vrot.lane.b32.xlu2 %v3243_v58, %s2805_s28  ;;  %2451 = vmatmul.msk.f32.gmra.mxu1 %vm139_vm5, %v3347_v45 }
 0x157   :  { %2490 = vmatmul.msk.f32.gmra.mxu2 %vm139_vm5, %v3356_v48  ;;  %2495 = vmatmul.msk.f32.gmra.mxu3 %vm139_vm5, %v3356_v48 }
 0x158   :  { %v746_v55 = vpop.permute.xlu0 %745 }
 0x159   :  { %v756_v56 = vsel %vm755_vm13, %v744_v51, %v746_v55 }
 0x15a   :  { %1457 = vrot.lane.b32.xlu0 %v3262_v1, %s2805_s28  ;;  %1687 = vrot.lane.b32.xlu1 %v3182_v37, %s2807_s30  ;;  %v748_v2 = vpop.permute.xlu1 %747 }
 0x15b   :  { %v757_v5 = vsel %vm755_vm13, %v746_v55, %v748_v2  ;;  %2473 = vmatpush.msk.msrb.mxu0 %vm50_vm1, %v756_v56  ;;  %v3485_v41 = vpop.f32.mrf.mxu2  ;;  %v3487_v46 = vpop.f32.mrf.mxu3 }
 0x15c   :  { %2479 = vmatpush.msk.msrb.mxu1 %vm51_vm3, %v757_v5  ;;  %4323 = vst [vmem:[#allocation14_spill] sm:$0xff] %v3485_v41 }
 0x15d   :  { %2474 = vmatmul.msk.f32.vlgmr.msrb.gmra.mxu0 %vm139_vm5, %v3377_v3  ;;  %4324 = vst [vmem:[#allocation15_spill] sm:$0xff] %v3487_v46 }
 0x15e   :  { %1689 = vrot.lane.b32.xlu2 %v3233_v52, %s2807_s30  ;;  %2480 = vmatmul.msk.f32.vlgmr.msrb.gmra.mxu1 %vm139_vm5, %v3377_v3 }
 0x15f   :  { %2491 = vmatmul.msk.f32.gmra.mxu2 %vm139_vm5, %v3387_v6  ;;  %2496 = vmatmul.msk.f32.gmra.mxu3 %vm139_vm5, %v3387_v6 }
 0x162   :  { %1691 = vrot.lane.b32.xlu0 %v3236_v54, %s2807_s30  ;;  %2700 = vrot.lane.b32.xlu1 %v3255_v0, %s2807_s30 }
 0x165   :  { %2475 = vmatmul.msk.f32.gmra.mxu0 %vm139_vm5, %v3406_v10 }
 0x166   :  { %1685 = vrot.lane.b32.xlu2 %v3262_v1, %s2807_s30  ;;  %2481 = vmatmul.msk.f32.gmra.mxu1 %vm139_vm5, %v3406_v10 }
 0x167   :  { %2492 = vmatmul.msk.f32.gmra.mxu2 %vm139_vm5, %v2487_v11  ;;  %2497 = vmatmul.msk.f32.gmra.mxu3 %vm139_vm5, %v2487_v11 }
 0x16a   :  { %1571 = vrot.lane.b32.xlu0 %v3182_v37, %s2804_s27  ;;  %1573 = vrot.lane.b32.xlu1 %v3233_v52, %s2804_s27 }
 0x16d   :  { %2476 = vmatmul.msk.f32.gmra.mxu0 %vm139_vm5, %v3426_v12 }
 0x16e   :  { %1575 = vrot.lane.b32.xlu2 %v3236_v54, %s2804_s27  ;;  %2482 = vmatmul.msk.f32.gmra.mxu1 %vm139_vm5, %v3426_v12 }
 0x172   :  { %1565 = vrot.lane.b32.xlu0 %v3246_v59, %s2804_s27  ;;  %1567 = vrot.lane.b32.xlu1 %v3243_v58, %s2804_s27 }
 0x174   :  { %v3447_v25 = vpop.f32.mrf.mxu0  ;;  %v3449_v15 = vpop.f32.mrf.mxu1 }
 0x175   :  { %2477 = vmatmul.msk.f32.gmra.mxu0 %vm139_vm5, %v3445_v24 }
 0x176   :  { %1569 = vrot.lane.b32.xlu2 %v3262_v1, %s2804_s27  ;;  %2483 = vmatmul.msk.f32.gmra.mxu1 %vm139_vm5, %v3445_v24  ;;  %s2368_s27 = sshll.u32 %s4305_s5, 4  ;;  %s2369_s27 = int_to_ptr.hbm [resolvable:$true] %s2368_s27 }
 0x17a   :  { %1899 = vrot.lane.b32.xlu0 %v3182_v37, %s2809_s16  ;;  %1901 = vrot.lane.b32.xlu1 %v3233_v52, %s2809_s16 }
 0x17c   :  { %v3465_v27 = vpop.f32.mrf.mxu0  ;;  %v3467_v31 = vpop.f32.mrf.mxu1 }
 0x17d   :  { %v1292_v40 = vpop.permute.xlu2 %1291 }
 0x17e   :  { %1903 = vrot.lane.b32.xlu2 %v3236_v54, %s2809_s16 }
 0x182   :  { %1893 = vrot.lane.b32.xlu0 %v3246_v59, %s2809_s16  ;;  %1895 = vrot.lane.b32.xlu1 %v3243_v58, %s2809_s16 }
 0x184   :  { %v3479_v36 = vpop.f32.mrf.mxu0  ;;  %v3481_v39 = vpop.f32.mrf.mxu1 }
 0x185   :  { %4321 = vst [vmem:[#allocation12_spill] sm:$0xff] %v3479_v36 }
 0x186   :  { %4322 = vst [vmem:[#allocation13_spill] sm:$0xff] %v3481_v39  ;;  %1897 = vrot.lane.b32.xlu2 %v3262_v1, %s2809_s16  ;;  %v2811_v39 = vmov 0  }
 0x187   :  { %2710 = vset.pattern.permute.xlu0 %v2811_v39  ;;  %2711 = vset.pattern.permute.xlu1 %v2811_v39 }
 0x188   :  { %v3503_v56 = vpop.f32.mrf.mxu2  ;;  %v3505_v2 = vpop.f32.mrf.mxu3  ;;  %2709 = vset.pattern.permute.xlu2 %v2811_v39 }
 0x18a   :  { %1787 = vrot.lane.b32.xlu0 %v3182_v37, %s2806_s29  ;;  %1789 = vrot.lane.b32.xlu1 %v3233_v52, %s2806_s29 }
 0x18c   :  { %v3493_v47 = vpop.f32.mrf.mxu0  ;;  %v3495_v51 = vpop.f32.mrf.mxu1 }
 0x18d   :  { %4325 = vst [vmem:[#allocation16_spill] sm:$0xff] %v3493_v47 }
 0x18e   :  { %4326 = vst [vmem:[#allocation17_spill] sm:$0xff] %v3495_v51  ;;  %1791 = vrot.lane.b32.xlu2 %v3236_v54, %s2806_s29 }
 0x190   :  { %v2696_v55 = vpop.permute.xlu2 %2695 }
 0x191   :  { %v3517_v51 = vpop.f32.mrf.mxu2  ;;  %v3519_v20 = vpop.f32.mrf.mxu3  ;;  %v2698_v47 = vunpack.i.h.bf16 %v2696_v55  ;;  %v2697_v23 = vunpack.i.l.bf16 %v2696_v55 }
 0x192   :  { %1781 = vrot.lane.b32.xlu0 %v3246_v59, %s2806_s29  ;;  %1783 = vrot.lane.b32.xlu1 %v3243_v58, %s2806_s29  ;;  %4328 = vst [vmem:[#allocation19_spill] sm:$0xff] %v3517_v51 }
 0x193   :  { %4329 = vst [vmem:[#allocation20_spill] sm:$0xff] %v3519_v20  ;;  %v1297_v55 = vsel %vm132_vm4, %v2697_v23, %v2698_v47 }
 0x194   :  { %v360_v5 = vpop.f32.mrf.mxu0  ;;  %v389_v11 = vpop.f32.mrf.mxu1 }
 0x196   :  { %1785 = vrot.lane.b32.xlu2 %v3262_v1, %s2806_s29  ;;  %s2813_s29 = smov 256  }
 0x198   :  { %v972_v6 = vpop.permute.xlu2 %971 }
 0x199   :  { %v3540_v26 = vpop.f32.mrf.mxu2  ;;  %v3542_v39 = vpop.f32.mrf.mxu3 }
 0x19a   :  { %2115 = vrot.lane.b32.xlu0 %v3182_v37, %s2810_s12  ;;  %2117 = vrot.lane.b32.xlu1 %v3233_v52, %s2810_s12  ;;  %4331 = vst [vmem:[#allocation22_spill] sm:$0xff] %v3542_v39  ;;  %v280_v39 = vadd.f32 %v3430_v22, %v3449_v15  ;;  %v3584_v15 = vld [vmem:[%s4302_s2 + $0x100] sm:$0xff] }
 0x19c   :  { %v3513_v48 = vpop.f32.mrf.mxu0  ;;  %v3515_v46 = vpop.f32.mrf.mxu1  ;;  %v402_v22 = vadd.f32 %v389_v11, %v280_v39  ;;  %v64_v11 = vld [vmem:[%s4303_s3] sm:$0xff] }
 0x19d   :  { %4327 = vst [vmem:[#allocation18_spill] sm:$0xff] %v3515_v46 }
 0x19e   :  { %2119 = vrot.lane.b32.xlu2 %v3236_v54, %s2810_s12 }
 0x1a0   :  { %v3523_v41 = vpop.permute.xlu2 %965 }
 0x1a2   :  { %2109 = vrot.lane.b32.xlu0 %v3246_v59, %s2810_s12  ;;  %2111 = vrot.lane.b32.xlu1 %v3243_v58, %s2810_s12 }
 0x1a4   :  { %v1294_v46 = vpop.permute.xlu0 %1293  ;;  %v1296_v13 = vpop.permute.xlu1 %1295 }
 0x1a5   :  { %v1299_v20 = vsel %vm132_vm4, %v1292_v40, %v1294_v46  ;;  %v1300_v51 = vsel %vm132_vm4, %v1294_v46, %v1296_v13  ;;  %v3531_v34 = vpop.f32.mrf.mxu0  ;;  %v3536_v36 = vpop.f32.mrf.mxu1 }
 0x1a6   :  { %2113 = vrot.lane.b32.xlu2 %v3262_v1, %s2810_s12  ;;  %2530 = vmatpush.msk.msra.mxu2 %vm152_vm2, %v1299_v20  ;;  %4330 = vst [vmem:[#allocation21_spill] sm:$0xff] %v3536_v36 }
 0x1a7   :  { %2535 = vmatpush.msk.msra.mxu3 %vm152_vm2, %v1300_v51 }
 0x1a8   :  { %v3544_v40 = vpop.permute.xlu2 %1461  ;;  %1334 = vmatpush.msra.mxu2 %v1297_v55  ;;  %v251_v55 = vadd.f32 %v3428_v16, %v3447_v25 }
 0x1a9   :  { %2531 = vmatmul.msk.f32.vlgmr.msra.gmra.mxu2 %vm139_vm5, %v3046_v43 }
 0x1aa   :  { %2015 = vrot.lane.b32.xlu0 %v3182_v37, %s2808_s14  ;;  %2017 = vrot.lane.b32.xlu1 %v3233_v52, %s2808_s14  ;;  %v401_v16 = vadd.f32 %v360_v5, %v251_v55  ;;  %v516_v5 = vadd.f32 %v3505_v2, %v402_v22 }
 0x1ac   :  { %v1290_v13 = vpop.permute.xlu0 %1289  ;;  %v970_v20 = vpop.permute.xlu1 %969 }
 0x1ad   :  { %v978_v23 = vsel %vm975_vm14, %v970_v20, %v972_v6  ;;  %v1298_v46 = vsel %vm132_vm4, %v2698_v47, %v1290_v13  ;;  %v3563_v36 = vpop.f32.mrf.mxu0  ;;  %v3569_v13 = vpop.f32.mrf.mxu1 }
 0x1ae   :  { %v986_v51 = vsel %vm60_vm8, %v978_v23, 0.0  ;;  %2019 = vrot.lane.b32.xlu2 %v3236_v54, %s2808_s14  ;;  %1363 = vmatpush.msra.mxu3 %v1298_v46  ;;  %v3571_v20 = vpop.f32.mrf.mxu2  ;;  %v3573_v54 = vpop.f32.mrf.mxu3 }
 0x1af   :  { %2502 = vmatpush.msk.msra.mxu0 %vm152_vm2, %v986_v51  ;;  %2536 = vmatmul.msk.f32.vlgmr.msra.gmra.mxu3 %vm139_vm5, %v3046_v43 }
 0x1b0   :  { %v3567_v47 = vpop.permute.xlu2 %1455 }
 0x1b1   :  { %2532 = vmatmul.msk.f32.gmra.mxu2 %vm139_vm5, %v3063_v53 }
 0x1b2   :  { %2705 = vrot.lane.b32.xlu0 %v3255_v0, %s2808_s14  ;;  %2013 = vrot.lane.b32.xlu1 %v3262_v1, %s2808_s14  ;;  %v515_v1 = vadd.f32 %v3503_v56, %v401_v16  ;;  %v66_v56 = vld [vmem:[%s4303_s3 + $0x10] sm:$0xff]  ;;  %s2814_s14 = smov 16  }
 0x1b4   :  { %v974_v43 = vpop.permute.xlu0 %973  ;;  %v964_v25 = vpop.permute.xlu1 %963 }
 0x1b5   :  { %v979_v23 = vsel %vm975_vm14, %v972_v6, %v974_v43  ;;  %v976_v46 = vsel %vm975_vm14, %v964_v25, %v3523_v41  ;;  %v1271_v6 = vsel %vm50_vm1, %v3182_v37, 0.0  ;;  %v3618_v25 = vld [vmem:[%s4302_s2 + $0x108] sm:$0xff] }
 0x1b6   :  { %v987_v0 = vsel %vm61_vm9, %v979_v23, 0.0  ;;  %2503 = vmatpush.msk.msra.mxu0 %vm60_vm8, %v976_v46  ;;  %v694_v16 = vpop.f32.mrf.mxu2  ;;  %v723_v22 = vpop.f32.mrf.mxu3 }
 0x1b7   :  { %2504 = vmatmul.msk.f32.vlgmr.msra.gmra.mxu0 %vm139_vm5, %v3584_v15  ;;  %2508 = vmatpush.msk.msra.mxu1 %vm152_vm2, %v987_v0 }
 0x1b8   :  { %2540 = vmatpush.msk.msrb.mxu0 %vm152_vm2, %v1271_v6  ;;  %v1690_v39 = vpop.permute.xlu2 %1689  ;;  %2537 = vmatmul.msk.f32.gmra.mxu3 %vm139_vm5, %v3063_v53 }
 0x1b9   :  { %2533 = vmatmul.msk.f32.gmra.mxu2 %vm139_vm5, %v3085_v60 }
 0x1ba   :  { %2541 = vmatpush.msk.msrb.mxu0 %vm50_vm1, %v3246_v59  ;;  %v580_v37 = vpop.f32.mrf.mxu0  ;;  %v609_v2 = vpop.f32.mrf.mxu1  ;;  %1079 = vperm.xlu0 %2710, %v64_v11  }
 0x1bb   :  { %v621_v51 = vadd.f32 %v580_v37, %v515_v1  ;;  %v622_v55 = vadd.f32 %v609_v2, %v516_v5  ;;  %1089 = vperm.xlu1 %2711, %v66_v56   ;;  %v65_v56 = vld [vmem:[%s4303_s3 + $0x8] sm:$0xff] }
 0x1bc   :  { %v968_v53 = vpop.permute.xlu0 %967  ;;  %v1460_v43 = vpop.permute.xlu1 %1459  ;;  %1084 = vperm.xlu2 %2709, %v65_v56  }
 0x1bd   :  { %v977_v23 = vsel %vm975_vm14, %v3523_v41, %v968_v53  ;;  %v1467_v59 = vsel %vm307_vm7, %v1460_v43, %v3544_v40  ;;  %v3624_v46 = vadd.f32 %v694_v16, %v621_v51  ;;  %v3626_v0 = vadd.f32 %v723_v22, %v622_v55  ;;  %v3676_v55 = vld [vmem:[%s4302_s2 + $0x118] sm:$0xff] }
 0x1be   :  { %v1475_v1 = vsel %vm60_vm8, %v1467_v59, 0.0  ;;  %2509 = vmatpush.msk.msra.mxu1 %vm61_vm9, %v977_v23  ;;  %v1272_v41 = vsel %vm51_vm3, %v3233_v52, 0.0  ;;  %v3651_v52 = vld [vmem:[%s4302_s2 + $0x110] sm:$0xff]  ;;  %v67_v53 = vld [vmem:[%s4303_s3 + $0x18] sm:$0xff] }
 0x1bf   :  { %2505 = vmatmul.msk.f32.gmra.mxu0 %vm139_vm5, %v3618_v25  ;;  %2510 = vmatmul.msk.f32.vlgmr.msra.gmra.mxu1 %vm139_vm5, %v3584_v15 }
 0x1c0   :  { %2546 = vmatpush.msk.msrb.mxu1 %vm152_vm2, %v1272_v41  ;;  %2556 = vmatpush.msk.msrb.mxu2 %vm152_vm2, %v1475_v1  ;;  %v1686_v5 = vpop.permute.xlu2 %1685 }
 0x1c1   :  { %2534 = vmatmul.msk.f32.gmra.mxu2 %vm139_vm5, %v3119_v8  ;;  %2538 = vmatmul.msk.f32.gmra.mxu3 %vm139_vm5, %v3085_v60 }
 0x1c2   :  { %2547 = vmatpush.msk.msrb.mxu1 %vm51_vm3, %v3243_v58 }
 0x1c4   :  { %v1464_v6 = vpop.permute.xlu0 %1463  ;;  %v1454_v11 = vpop.permute.xlu1 %1453  ;;  %1094 = vperm.xlu2 %2709, %v67_v53  }
 0x1c5   :  { %v1468_v37 = vsel %vm307_vm7, %v3544_v40, %v1464_v6  ;;  %v1465_v60 = vsel %vm307_vm7, %v1454_v11, %v3567_v47 }
 0x1c6   :  { %v1476_v58 = vsel %vm61_vm9, %v1468_v37, 0.0  ;;  %2557 = vmatpush.msk.msrb.mxu2 %vm60_vm8, %v1465_v60 }
 0x1c7   :  { %2506 = vmatmul.msk.f32.gmra.mxu0 %vm139_vm5, %v3651_v52  ;;  %2511 = vmatmul.msk.f32.gmra.mxu1 %vm139_vm5, %v3618_v25 }
 0x1c8   :  { %2562 = vmatpush.msk.msrb.mxu3 %vm152_vm2, %v1476_v58  ;;  %v1576_v40 = vpop.permute.xlu2 %1575 }
 0x1c9   :  { %2539 = vmatmul.msk.f32.gmra.mxu3 %vm139_vm5, %v3119_v8  ;;  %2558 = vmatmul.msk.f32.vlgmr.msrb.gmra.mxu2 %vm139_vm5, %v3145_v21 }
 0x1cc   :  { %v1458_v2 = vpop.permute.xlu0 %1457  ;;  %v1688_v51 = vpop.permute.xlu1 %1687 }
 0x1cd   :  { %v1466_v16 = vsel %vm307_vm7, %v3567_v47, %v1458_v2  ;;  %v1695_v22 = vsel %vm540_vm11, %v1688_v51, %v1690_v39 }
 0x1ce   :  { %2563 = vmatpush.msk.msrb.mxu3 %vm61_vm9, %v1466_v16  ;;  %2588 = vmatpush.msk.msra.mxu2 %vm152_vm2, %v1695_v22  ;;  %v3739_v22 = vpop.f32.mrf.mxu3 }
 0x1cf   :  { %2507 = vmatmul.msk.f32.gmra.mxu0 %vm139_vm5, %v3676_v55  ;;  %2512 = vmatmul.msk.f32.gmra.mxu1 %vm139_vm5, %v3651_v52 }
 0x1d0   :  { %v1570_v43 = vpop.permute.xlu2 %1569 }
 0x1d1   :  { %2559 = vmatmul.msk.f32.gmra.mxu2 %vm139_vm5, %v3169_v32  ;;  %2564 = vmatmul.msk.f32.vlgmr.msrb.gmra.mxu3 %vm139_vm5, %v3145_v21 }
 0x1d4   :  { %v1692_v8 = vpop.permute.xlu0 %1691  ;;  %v2701_v47 = vpop.permute.xlu1 %2700 }
 0x1d5   :  { %v1696_v23 = vsel %vm540_vm11, %v1690_v39, %v1692_v8  ;;  %v2703_v59 = vunpack.i.h.bf16 %v2701_v47  ;;  %v2702_v1 = vunpack.i.l.bf16 %v2701_v47 }
 0x1d6   :  { %2593 = vmatpush.msk.msra.mxu3 %vm152_vm2, %v1696_v23 }
 0x1d7   :  { %2513 = vmatmul.msk.f32.gmra.mxu1 %vm139_vm5, %v3676_v55  ;;  %2542 = vmatmul.msk.f32.vlgmr.msrb.gmra.mxu0 %vm139_vm5, %v2994_v30  ;;  %v1693_v21 = vsel %vm540_vm11, %v2702_v1, %v2703_v59  ;;  %v1694_v41 = vsel %vm540_vm11, %v2703_v59, %v1686_v5 }
 0x1d8   :  { %1730 = vmatpush.msra.mxu2 %v1693_v21  ;;  %1759 = vmatpush.msra.mxu3 %v1694_v41  ;;  %v1904_v60 = vpop.permute.xlu2 %1903 }
 0x1d9   :  { %2560 = vmatmul.msk.f32.gmra.mxu2 %vm139_vm5, %v3200_v44  ;;  %2565 = vmatmul.msk.f32.gmra.mxu3 %vm139_vm5, %v3169_v32 }
 0x1dc   :  { %v1572_v39 = vpop.permute.xlu0 %1571  ;;  %v1574_v6 = vpop.permute.xlu1 %1573 }
 0x1dd   :  { %v1579_v11 = vsel %vm421_vm6, %v1572_v39, %v1574_v6  ;;  %v1580_v56 = vsel %vm421_vm6, %v1574_v6, %v1576_v40  ;;  %v3769_v39 = vpop.f32.mrf.mxu3 }
 0x1de   :  { %v1587_v37 = vsel %vm50_vm1, %v1579_v11, 0.0  ;;  %v1588_v5 = vsel %vm51_vm3, %v1580_v56, 0.0 }
 0x1df   :  { %2543 = vmatmul.msk.f32.gmra.mxu0 %vm139_vm5, %v3011_v33  ;;  %2548 = vmatmul.msk.f32.vlgmr.msrb.gmra.mxu1 %vm139_vm5, %v2994_v30  ;;  %v3729_v30 = vpop.f32.mrf.mxu2 }
 0x1e0   :  { %2572 = vmatpush.msk.msra.mxu0 %vm152_vm2, %v1587_v37  ;;  %2578 = vmatpush.msk.msra.mxu1 %vm152_vm2, %v1588_v5 }
 0x1e1   :  { %2561 = vmatmul.msk.f32.gmra.mxu2 %vm139_vm5, %v3222_v50  ;;  %2566 = vmatmul.msk.f32.gmra.mxu3 %vm139_vm5, %v3200_v44  ;;  %v1898_v44 = vpop.permute.xlu2 %1897 }
 0x1e4   :  { %v1566_v32 = vpop.permute.xlu0 %1565  ;;  %v1568_v58 = vpop.permute.xlu1 %1567 }
 0x1e5   :  { %v1577_v40 = vsel %vm421_vm6, %v1566_v32, %v1568_v58  ;;  %v1578_v2 = vsel %vm421_vm6, %v1568_v58, %v1570_v43  ;;  %v3747_v43 = vpop.f32.mrf.mxu0 }
 0x1e6   :  { %2573 = vmatpush.msk.msra.mxu0 %vm50_vm1, %v1577_v40  ;;  %2579 = vmatpush.msk.msra.mxu1 %vm51_vm3, %v1578_v2 }
 0x1e7   :  { %2544 = vmatmul.msk.f32.gmra.mxu0 %vm139_vm5, %v3026_v35  ;;  %2549 = vmatmul.msk.f32.gmra.mxu1 %vm139_vm5, %v3011_v33 }
 0x1e9   :  { %2567 = vmatmul.msk.f32.gmra.mxu3 %vm139_vm5, %v3222_v50  ;;  %2589 = vmatmul.msk.f32.vlgmr.msra.gmra.mxu2 %vm139_vm5, %v3273_v9  ;;  %v3755_v50 = vpop.f32.mrf.mxu2  ;;  %v1792_v23 = vpop.permute.xlu2 %1791 }
 0x1ec   :  { %v1900_v51 = vpop.permute.xlu0 %1899  ;;  %v1902_v16 = vpop.permute.xlu1 %1901 }
 0x1ed   :  { %v1907_v8 = vsel %vm755_vm13, %v1900_v51, %v1902_v16  ;;  %v1908_v47 = vsel %vm755_vm13, %v1902_v16, %v1904_v60  ;;  %v3797_v60 = vpop.f32.mrf.mxu3 }
 0x1ee   :  { %v1915_v53 = vsel %vm50_vm1, %v1907_v8, 0.0  ;;  %v1916_v33 = vsel %vm51_vm3, %v1908_v47, 0.0 }
 0x1ef   :  { %2545 = vmatmul.msk.f32.gmra.mxu0 %vm139_vm5, %v3035_v38  ;;  %2550 = vmatmul.msk.f32.gmra.mxu1 %vm139_vm5, %v3026_v35  ;;  %v3767_v35 = vpop.f32.mrf.mxu1 }
 0x1f0   :  { %2618 = vmatpush.msk.msrb.mxu2 %vm152_vm2, %v1915_v53  ;;  %2624 = vmatpush.msk.msrb.mxu3 %vm152_vm2, %v1916_v33 }
 0x1f1   :  { %2590 = vmatmul.msk.f32.gmra.mxu2 %vm139_vm5, %v3299_v18  ;;  %2594 = vmatmul.msk.f32.vlgmr.msra.gmra.mxu3 %vm139_vm5, %v3273_v9  ;;  %v3775_v9 = vpop.f32.mrf.mxu0  ;;  %v3781_v7 = vpop.f32.mrf.mxu2 }
 0x1f2   :  { %v1786_v11 = vpop.permute.xlu2 %1785 }
 0x1f4   :  { %v1894_v59 = vpop.permute.xlu0 %1893  ;;  %v1896_v1 = vpop.permute.xlu1 %1895 }
 0x1f5   :  { %v1905_v21 = vsel %vm755_vm13, %v1894_v59, %v1896_v1  ;;  %v1906_v41 = vsel %vm755_vm13, %v1896_v1, %v1898_v44  ;;  %v3823_v16 = vpop.f32.mrf.mxu3 }
 0x1f6   :  { %2619 = vmatpush.msk.msrb.mxu2 %vm50_vm1, %v1905_v21  ;;  %2625 = vmatpush.msk.msrb.mxu3 %vm51_vm3, %v1906_v41 }
 0x1f7   :  { %2551 = vmatmul.msk.f32.gmra.mxu1 %vm139_vm5, %v3035_v38  ;;  %2574 = vmatmul.msk.f32.vlgmr.msra.gmra.mxu0 %vm139_vm5, %v3074_v57 }
 0x1f9   :  { %2591 = vmatmul.msk.f32.gmra.mxu2 %vm139_vm5, %v3318_v29  ;;  %2595 = vmatmul.msk.f32.gmra.mxu3 %vm139_vm5, %v3299_v18  ;;  %v3795_v18 = vpop.f32.mrf.mxu1  ;;  %v3803_v32 = vpop.f32.mrf.mxu0 }
 0x1fa   :  { %v3807_v44 = vpop.f32.mrf.mxu2  ;;  %v2120_v51 = vpop.permute.xlu2 %2119 }
 0x1fc   :  { %v1788_v14 = vpop.permute.xlu0 %1787  ;;  %v1790_v6 = vpop.permute.xlu1 %1789 }
 0x1fd   :  { %v1795_v56 = vsel %vm641_vm10, %v1788_v14, %v1790_v6  ;;  %v1796_v38 = vsel %vm641_vm10, %v1790_v6, %v1792_v23 }
 0x1fe   :  { %v1803_v37 = vsel %vm60_vm8, %v1795_v56, 0.0  ;;  %v1804_v5 = vsel %vm61_vm9, %v1796_v38, 0.0 }
 0x1ff   :  { %2575 = vmatmul.msk.f32.gmra.mxu0 %vm139_vm5, %v3110_v4  ;;  %2580 = vmatmul.msk.f32.vlgmr.msra.gmra.mxu1 %vm139_vm5, %v3074_v57 }
 0x200   :  { %2602 = vmatpush.msk.msrb.mxu0 %vm152_vm2, %v1803_v37  ;;  %2608 = vmatpush.msk.msrb.mxu1 %vm152_vm2, %v1804_v5 }
 0x201   :  { %2592 = vmatmul.msk.f32.gmra.mxu2 %vm139_vm5, %v3347_v45  ;;  %2596 = vmatmul.msk.f32.gmra.mxu3 %vm139_vm5, %v3318_v29  ;;  %v3821_v29 = vpop.f32.mrf.mxu1  ;;  %v808_v23 = vpop.f32.mrf.mxu0 }
 0x202   :  { %v3835_v59 = vpop.f32.mrf.mxu2  ;;  %v2114_v1 = vpop.permute.xlu2 %2113 }
 0x204   :  { %v1782_v58 = vpop.permute.xlu0 %1781  ;;  %v1784_v40 = vpop.permute.xlu1 %1783 }
 0x205   :  { %v1793_v57 = vsel %vm641_vm10, %v1782_v58, %v1784_v40  ;;  %v1794_v2 = vsel %vm641_vm10, %v1784_v40, %v1786_v11  ;;  %v3847_v11 = vpop.f32.mrf.mxu3 }
 0x206   :  { %2603 = vmatpush.msk.msrb.mxu0 %vm60_vm8, %v1793_v57  ;;  %2609 = vmatpush.msk.msrb.mxu1 %vm61_vm9, %v1794_v2  ;;  %v254_v2 = vadd.f32 %v3453_v19, %v3465_v27 }
 0x207   :  { %2576 = vmatmul.msk.f32.gmra.mxu0 %vm139_vm5, %v3136_v17  ;;  %2581 = vmatmul.msk.f32.gmra.mxu1 %vm139_vm5, %v3110_v4 }
 0x209   :  { %2597 = vmatmul.msk.f32.gmra.mxu3 %vm139_vm5, %v3347_v45  ;;  %2620 = vmatmul.msk.f32.vlgmr.msrb.gmra.mxu2 %vm139_vm5, %v3377_v3  ;;  %v3843_v14 = vpop.f32.mrf.mxu1 }
 0x20a   :  { %v3861_v56 = vpop.f32.mrf.mxu2  ;;  %v2020_v61 = vpop.permute.xlu2 %2019 }
 0x20c   :  { %v2116_v8 = vpop.permute.xlu0 %2115  ;;  %v2118_v47 = vpop.permute.xlu1 %2117 }
 0x20d   :  { %v2123_v53 = vsel %vm975_vm14, %v2116_v8, %v2118_v47  ;;  %v2124_v33 = vsel %vm975_vm14, %v2118_v47, %v2120_v51 }
 0x20e   :  { %v2131_v4 = vsel %vm60_vm8, %v2123_v53, 0.0  ;;  %v2132_v45 = vsel %vm61_vm9, %v2124_v33, 0.0  ;;  %v403_v53 = vadd.f32 %v3513_v48, %v254_v2 }
 0x20f   :  { %2577 = vmatmul.msk.f32.gmra.mxu0 %vm139_vm5, %v3160_v28  ;;  %2582 = vmatmul.msk.f32.gmra.mxu1 %vm139_vm5, %v3136_v17 }
 0x210   :  { %2648 = vmatpush.msk.msra.mxu2 %vm152_vm2, %v2131_v4  ;;  %2654 = vmatpush.msk.msra.mxu3 %vm152_vm2, %v2132_v45 }
 0x211   :  { %2621 = vmatmul.msk.f32.gmra.mxu2 %vm139_vm5, %v3406_v10  ;;  %2626 = vmatmul.msk.f32.vlgmr.msrb.gmra.mxu3 %vm139_vm5, %v3377_v3  ;;  %v811_v3 = vpop.f32.mrf.mxu0 }
 0x212   :  { %v3881_v40 = vpop.f32.mrf.mxu2 }
 0x214   :  { %v2110_v21 = vpop.permute.xlu0 %2109  ;;  %v2112_v41 = vpop.permute.xlu1 %2111 }
 0x215   :  { %v2121_v6 = vsel %vm975_vm14, %v2110_v21, %v2112_v41  ;;  %v2122_v17 = vsel %vm975_vm14, %v2112_v41, %v2114_v1  ;;  %v4333_v1 = vld [vmem:[#allocation12_spill] sm:$0xff]  ;;  %v4334_v21 = vld [vmem:[#allocation10_spill] sm:$0xff]  ;;  %v4335_v41 = vld [vmem:[#allocation19_spill] sm:$0xff] }
 0x216   :  { %2649 = vmatpush.msk.msra.mxu2 %vm60_vm8, %v2121_v6  ;;  %2655 = vmatpush.msk.msra.mxu3 %vm61_vm9, %v2122_v17  ;;  %v257_v48 = vadd.f32 %v4334_v21, %v4333_v1  ;;  %v517_v6 = vadd.f32 %v4335_v41, %v403_v53  ;;  %v849_v17 = vadd.f32 %v808_v23, %v3624_v46  ;;  %v4343_v21 = vld [vmem:[#allocation6_spill] sm:$0xff] }
 0x217   :  { %2583 = vmatmul.msk.f32.gmra.mxu1 %vm139_vm5, %v3160_v28  ;;  %2604 = vmatmul.msk.f32.vlgmr.msrb.gmra.mxu0 %vm139_vm5, %v3191_v42  ;;  %v3867_v28 = vpop.f32.mrf.mxu1 }
 0x218   :  { %v955_v46 = vadd.f32 %v3807_v44, %v849_v17 }
 0x219   :  { %2622 = vmatmul.msk.f32.gmra.mxu2 %vm139_vm5, %v3426_v12  ;;  %2627 = vmatmul.msk.f32.gmra.mxu3 %vm139_vm5, %v3406_v10  ;;  %v3873_v10 = vpop.f32.mrf.mxu3  ;;  %v3879_v58 = vpop.f32.mrf.mxu0 }
 0x21c   :  { %v2016_v38 = vpop.permute.xlu0 %2015  ;;  %v2018_v37 = vpop.permute.xlu1 %2017 }
 0x21d   :  { %v2023_v62 = vsel %vm874_vm12, %v2016_v38, %v2018_v37  ;;  %v2024_v5 = vsel %vm874_vm12, %v2018_v37, %v2020_v61  ;;  %v4337_v61 = vld [vmem:[#allocation18_spill] sm:$0xff]  ;;  %v623_v37 = vadd.f32 %v3747_v43, %v517_v6 }
 0x21e   :  { %2634 = vmatpush.msk.msra.mxu0 %vm152_vm2, %v2023_v62  ;;  %2639 = vmatpush.msk.msra.mxu1 %vm152_vm2, %v2024_v5 }
 0x21f   :  { %2605 = vmatmul.msk.f32.gmra.mxu0 %vm139_vm5, %v3215_v49  ;;  %2610 = vmatmul.msk.f32.vlgmr.msrb.gmra.mxu1 %vm139_vm5, %v3191_v42  ;;  %v3892_v33 = vpop.f32.mrf.mxu1  ;;  %v737_v53 = vadd.f32 %v3729_v30, %v623_v37 }
 0x221   :  { %2623 = vmatmul.msk.f32.gmra.mxu2 %vm139_vm5, %v3445_v24  ;;  %2628 = vmatmul.msk.f32.gmra.mxu3 %vm139_vm5, %v3426_v12  ;;  %v3898_v19 = vpop.f32.mrf.mxu3  ;;  %v3902_v4 = vpop.f32.mrf.mxu0 }
 0x224   :  { %v2706_v57 = vpop.permute.xlu0 %2705  ;;  %v2014_v47 = vpop.permute.xlu1 %2013 }
 0x225   :  { %v2708_v51 = vunpack.i.h.bf16 %v2706_v57  ;;  %v2707_v8 = vunpack.i.l.bf16 %v2706_v57  ;;  %v4339_v57 = vld [vmem:[#allocation11_spill] sm:$0xff] }
 0x227   :  { %2606 = vmatmul.msk.f32.gmra.mxu0 %vm139_vm5, %v3251_v63  ;;  %2611 = vmatmul.msk.f32.gmra.mxu1 %vm139_vm5, %v3215_v49  ;;  %v2021_v42 = vsel %vm874_vm12, %v2707_v8, %v2708_v51  ;;  %v2022_v12 = vsel %vm874_vm12, %v2708_v51, %v2014_v47  ;;  %v4332_v49 = vld [vmem:[#allocation9_spill] sm:$0xff]  ;;  %v3924_v23 = vpop.f32.mrf.mxu1  ;;  %v4341_v47 = vld [vmem:[#allocation16_spill] sm:$0xff] }
 0x228   :  { %2058 = vmatpush.msra.mxu0 %v2021_v42  ;;  %2087 = vmatpush.msra.mxu1 %v2022_v12  ;;  %v283_v27 = vadd.f32 %v4332_v49, %v3467_v31  ;;  %v405_v31 = vadd.f32 %v3531_v34, %v257_v48  ;;  %v4340_v34 = vld [vmem:[#allocation20_spill] sm:$0xff]  ;;  %v4342_v42 = vld [vmem:[#allocation14_spill] sm:$0xff]  ;;  %v850_v49 = vadd.f32 %v3843_v14, %v3626_v0  ;;  %v4344_v48 = vld [vmem:[#allocation21_spill] sm:$0xff] }
 0x229   :  { %2629 = vmatmul.msk.f32.gmra.mxu3 %vm139_vm5, %v3445_v24  ;;  %2650 = vmatmul.msk.f32.vlgmr.msra.gmra.mxu2 %vm139_vm5, %v3584_v15  ;;  %v4336_v24 = vld [vmem:[#allocation5_spill] sm:$0xff]  ;;  %v260_v12 = vadd.f32 %v4342_v42, %v4341_v47 }
 0x22a   :  { %v404_v38 = vadd.f32 %v4337_v61, %v283_v27  ;;  %v851_v27 = vadd.f32 %v811_v3, %v737_v53  ;;  %v956_v0 = vadd.f32 %v3823_v16, %v850_v49  ;;  %v3954_v3 = vpop.permute.xlu2 %1084 }
 0x22c   :  { %v3904_v45 = vpop.f32.mrf.mxu2  ;;  %v3926_v5 = vpop.permute.xlu0 %1079  ;;  %v518_v51 = vadd.f32 %v4340_v34, %v404_v38  ;;  %v957_v14 = vadd.f32 %v3835_v59, %v851_v27  ;;  %v4346_v59 = vld [vmem:[#allocation17_spill] sm:$0xff] }
 0x22e   :  { %v624_v6 = vadd.f32 %v3767_v35, %v518_v51  ;;  %v4345_v35 = vld [vmem:[#allocation22_spill] sm:$0xff] }
 0x22f   :  { %2607 = vmatmul.msk.f32.gmra.mxu0 %vm139_vm5, %v4336_v24  ;;  %2612 = vmatmul.msk.f32.gmra.mxu1 %vm139_vm5, %v3251_v63  ;;  %v4338_v63 = vld [vmem:[#allocation13_spill] sm:$0xff] }
 0x230   :  { %v286_v2 = vadd.f32 %v4339_v57, %v4338_v63  ;;  %v4347_v63 = vld [vmem:[#allocation15_spill] sm:$0xff] }
 0x231   :  { %2651 = vmatmul.msk.f32.gmra.mxu2 %vm139_vm5, %v3618_v25  ;;  %2656 = vmatmul.msk.f32.vlgmr.msra.gmra.mxu3 %vm139_vm5, %v3584_v15  ;;  %v519_v15 = vadd.f32 %v3540_v26, %v405_v31  ;;  %v407_v26 = vadd.f32 %v3563_v36, %v260_v12  ;;  %v289_v57 = vadd.f32 %v4347_v63, %v4346_v59 }
 0x232   :  { %v3921_v62 = vpop.f32.mrf.mxu3  ;;  %v406_v41 = vadd.f32 %v4344_v48, %v286_v2 }
 0x233   :  { %v625_v30 = vadd.f32 %v3775_v9, %v519_v15  ;;  %v738_v9 = vadd.f32 %v3739_v22, %v624_v6  ;;  %v521_v31 = vadd.f32 %v3571_v20, %v407_v26  ;;  %v4349_v26 = vld [vmem:[#allocation8_spill] sm:$0xff] }
 0x234   :  { %v1028_v43 = vpop.f32.mrf.mxu0  ;;  %v3931_v8 = vpop.f32.mrf.mxu2  ;;  %v520_v36 = vadd.f32 %v4345_v35, %v406_v41 }
 0x235   :  { %v1069_v44 = vadd.f32 %v1028_v43, %v955_v46  ;;  %v739_v37 = vadd.f32 %v3755_v50, %v625_v30  ;;  %v852_v2 = vadd.f32 %v3867_v28, %v738_v9  ;;  %v4348_v43 = vld [vmem:[#allocation7_spill] sm:$0xff]  ;;  %v627_v47 = vadd.f32 %v3803_v32, %v521_v31 }
 0x236   :  { %v626_v20 = vadd.f32 %v3795_v18, %v520_v36  ;;  %v408_v28 = vadd.f32 %v3569_v13, %v289_v57 }
 0x237   :  { %v1097_v1 = vadd.f32 %v3926_v5, %v1069_v44  ;;  %2613 = vmatmul.msk.f32.gmra.mxu1 %vm139_vm5, %v4336_v24  ;;  %2635 = vmatmul.msk.f32.vlgmr.msra.gmra.mxu0 %vm139_vm5, %v4343_v21  ;;  %v853_v34 = vadd.f32 %v3879_v58, %v739_v37  ;;  %v958_v15 = vadd.f32 %v3847_v11, %v852_v2  ;;  %v3985_v44 = vpop.permute.xlu1 %1089 }
 0x238   :  { %v740_v32 = vadd.f32 %v3769_v39, %v626_v20 }
 0x239   :  { %v2514_v17 = vmul.f32 -1.442695, %v1097_v1  ;;  %2652 = vmatmul.msk.f32.gmra.mxu2 %vm139_vm5, %v3651_v52  ;;  %2657 = vmatmul.msk.f32.gmra.mxu3 %vm139_vm5, %v3618_v25  ;;  %v959_v53 = vadd.f32 %v3861_v56, %v853_v34  ;;  %v522_v56 = vadd.f32 %v3573_v54, %v408_v28 }
 0x23a   :  { %v854_v48 = vadd.f32 %v3892_v33, %v740_v32 }
 0x23b   :  { %2712 = vpow2.f32 %v2514_v17  ;;  %v3956_v24 = vpop.f32.mrf.mxu3  ;;  %v628_v33 = vadd.f32 %v3821_v29, %v522_v56  ;;  %v2633_v29 = vld [vmem:[%s4302_s2 + $0xf8] sm:$0xff] }
 0x23c   :  { %v1031_v61 = vpop.f32.mrf.mxu0  ;;  %v1057_v38 = vpop.f32.mrf.mxu1 }
 0x23d   :  { %v1071_v25 = vadd.f32 %v1031_v61, %v957_v14  ;;  %v1070_v46 = vadd.f32 %v1057_v38, %v956_v0  ;;  %v3962_v16 = vpop.f32.mrf.mxu2  ;;  %v742_v59 = vadd.f32 %v3797_v60, %v628_v33 }
 0x23f   :  { %v1098_v51 = vadd.f32 %v3926_v5, %v1070_v46  ;;  %v1099_v22 = vadd.f32 %v3954_v3, %v1071_v25  ;;  %2636 = vmatmul.msk.f32.gmra.mxu0 %vm139_vm5, %v4348_v43  ;;  %2640 = vmatmul.msk.f32.vlgmr.msra.gmra.mxu1 %vm139_vm5, %v4343_v21  ;;  %v4025_v46 = vpop.permute.xlu2 %1094  ;;  %v856_v2 = vadd.f32 %v3924_v23, %v742_v59 }
 0x241   :  { %v2713_v50 = vpop.eup %2712  ;;  %v2515_v42 = vmul.f32 -1.442695, %v1098_v51  ;;  %v1143_v12 = vadd.f32 1.0, %v1099_v22  ;;  %2653 = vmatmul.msk.f32.gmra.mxu2 %vm139_vm5, %v3676_v55  ;;  %2658 = vmatmul.msk.f32.gmra.mxu3 %vm139_vm5, %v3651_v52  ;;  %v741_v52 = vadd.f32 %v3781_v7, %v627_v47 }
 0x242   :  { %v3981_v58 = vadd.f32 1.0, %v2713_v50 }
 0x243   :  { %2714 = vpow2.f32 %v2515_v42  ;;  %v2516_v18 = vmul.f32 -1.442695, %v1143_v12  ;;  %v855_v41 = vadd.f32 %v3902_v4, %v741_v52  ;;  %v960_v4 = vadd.f32 %v3873_v10, %v854_v48 }
 0x244   :  { %2716 = vrcp.f32 %v3981_v58  ;;  %v1034_v49 = vpop.f32.mrf.mxu0  ;;  %v1060_v27 = vpop.f32.mrf.mxu1  ;;  %v1122_v23 = vand.u32 2147483647, %v3981_v58  ;;  %v1124_v12 = vand.u32 2147483648, %v3981_v58  ;;  %vm1118_vm0 = vweird.f32 %v3981_v58 }
 0x245   :  { %2718 = vpow2.f32 %v2516_v18  ;;  %v1073_v13 = vadd.f32 %v1034_v49, %v959_v53  ;;  %v1072_v1 = vadd.f32 %v1060_v27, %v958_v15  ;;  %v3990_v21 = vpop.f32.mrf.mxu2  ;;  %v3992_v11 = vpop.f32.mrf.mxu3  ;;  %v961_v35 = vadd.f32 %v3881_v40, %v855_v41 }
 0x246   :  { %v962_v53 = vadd.f32 %v3898_v19, %v856_v2  ;;  %vm4058_vm1 = vcmp.eq.f32.partialorder %v1122_v23, 8.507059e+37  ;;  %v1125_v48 = vor.u32 1.1754944e-38, %v1124_v12 }
 0x247   :  { %v1100_v39 = vadd.f32 %v3954_v3, %v1072_v1  ;;  %v1101_v6 = vadd.f32 %v3985_v44, %v1073_v13  ;;  %2637 = vmatmul.msk.f32.gmra.mxu0 %vm139_vm5, %v4349_v26  ;;  %2641 = vmatmul.msk.f32.gmra.mxu1 %vm139_vm5, %v4348_v43 }
 0x249   :  { %v2715_v7 = vpop.eup %2714  ;;  %v1144_v30 = vadd.f32 1.0, %v1100_v39  ;;  %v2518_v17 = vmul.f32 -1.442695, %v1101_v6  ;;  %2659 = vmatmul.msk.f32.gmra.mxu3 %vm139_vm5, %v3676_v55 }
 0x24a   :  { %v4005_v54 = vpop.eup %2716  ;;  %v4009_v0 = vadd.f32 1.0, %v2715_v7 }
 0x24b   :  { %v2719_v14 = vpop.eup %2718  ;;  %v1114_v36 = vmul.f32 %v4005_v54, %v3981_v58  ;;  %v2517_v9 = vmul.f32 -1.442695, %v1144_v30  ;;  %2720 = vpow2.f32 %v2518_v17  ;;  %vm1119_vm15 = vweird.f32 %v4005_v54 }
 0x24c   :  { %2722 = vrcp.f32 %v4009_v0  ;;  %v4015_v61 = vadd.f32 1.0, %v2719_v14  ;;  %v1037_v55 = vpop.f32.mrf.mxu0  ;;  %v1063_v38 = vpop.f32.mrf.mxu1  ;;  %v1139_v39 = vand.u32 2147483648, %v4009_v0  ;;  %vm4064_vm2 = vmor %vm1118_vm0, %vm1119_vm15  ;;  %vm1133_vm4 = vweird.f32 %v4009_v0 }
 0x24d   :  { %2724 = vpow2.f32 %v2517_v9  ;;  %v1075_v10 = vadd.f32 %v1037_v55, %v961_v35  ;;  %v1074_v31 = vadd.f32 %v1063_v38, %v960_v4  ;;  %v4020_v37 = vpop.f32.mrf.mxu3  ;;  %v4022_v40 = vpop.f32.mrf.mxu2  ;;  %v1115_v25 = vsub.f32 1.0, %v1114_v36 }
 0x24e   :  { %2726 = vrcp.f32 %v4015_v61  ;;  %v1162_v1 = vand.u32 2147483647, %v4015_v61  ;;  %v1164_v41 = vand.u32 2147483648, %v4015_v61  ;;  %v1137_v58 = vand.u32 2147483647, %v4009_v0 }
 0x24f   :  { %v1102_v63 = vadd.f32 %v3985_v44, %v1074_v31  ;;  %2638 = vmatmul.msk.f32.gmra.mxu0 %vm139_vm5, %v2633_v29  ;;  %2642 = vmatmul.msk.f32.gmra.mxu1 %vm139_vm5, %v4349_v26  ;;  %v1103_v51 = vadd.f32 %v4025_v46, %v1075_v10  ;;  %v1116_v20 = vmul.f32 %v4005_v54, %v1115_v25 }
 0x250   :  { %vm4082_vm6 = vcmp.eq.f32.partialorder %v1162_v1, 8.507059e+37  ;;  %vm4099_vm9 = vcmp.eq.f32.partialorder %v1137_v58, 8.507059e+37 }
 0x251   :  { %v2721_v57 = vpop.eup %2720  ;;  %v2519_v34 = vmul.f32 -1.442695, %v1102_v63  ;;  %v1117_v52 = vadd.f32 %v4005_v54, %v1116_v20 }
 0x252   :  { %v4034_v22 = vpop.eup %2722  ;;  %v4036_v43 = vadd.f32 1.0, %v2721_v57 }
 0x253   :  { %v2725_v60 = vpop.eup %2724  ;;  %v1129_v50 = vmul.f32 %v4034_v22, %v4009_v0  ;;  %2728 = vpow2.f32 %v2519_v34  ;;  %v1121_v4 = vsel %vm4064_vm2, %v4005_v54, %v1117_v52  ;;  %v72_v54 = vld [vmem:[%s4301_s1] sm:$0xff]  ;;  %vm1134_vm8 = vweird.f32 %v4034_v22 }
 0x254   :  { %v2727_v47 = vpop.eup %2726  ;;  %v4041_v42 = vadd.f32 1.0, %v2725_v60  ;;  %2730 = vrcp.f32 %v4036_v43  ;;  %v1066_v28 = vpop.f32.mrf.mxu1  ;;  %v1126_v63 = vsel %vm4058_vm1, %v1125_v48, %v1121_v4  ;;  %v1202_v20 = vand.u32 2147483648, %v4036_v43  ;;  %vm4125_vm12 = vmor %vm1133_vm4, %vm1134_vm8 }
 0x255   :  { %v1412_v15 = vpop.f32.mrf.mxu0  ;;  %v1154_v18 = vmul.f32 %v2727_v47, %v4015_v61  ;;  %2732 = vtanh.f32 %v1103_v51  ;;  %v4048_v32 = vpop.f32.mrf.mxu2  ;;  %v1130_v27 = vsub.f32 1.0, %v1129_v50  ;;  %v1076_v19 = vadd.f32 %v1066_v28, %v962_v53 }
 0x256   :  { %v4050_v49 = vpop.f32.mrf.mxu3  ;;  %2734 = vrcp.f32 %v4041_v42  ;;  %vm1159_vm3 = vweird.f32 %v2727_v47  ;;  %v1413_v30 = vadd.f32 %v1412_v15, %v3904_v45  ;;  %v1177_v1 = vand.u32 2147483647, %v4041_v42 }
 0x257   :  { %v1155_v13 = vsub.f32 1.0, %v1154_v18  ;;  %2643 = vmatmul.msk.f32.gmra.mxu1 %vm139_vm5, %v2633_v29  ;;  %vm1158_vm5 = vweird.f32 %v4015_v61  ;;  %v1131_v14 = vmul.f32 %v4034_v22, %v1130_v27  ;;  %v1104_v45 = vadd.f32 %v4025_v46, %v1076_v19 }
 0x258   :  { %vm1160_vm7 = vmor %vm1158_vm5, %vm1159_vm3  ;;  %v1165_v61 = vor.u32 1.1754944e-38, %v1164_v41  ;;  %v1140_v29 = vor.u32 1.1754944e-38, %v1139_v39  ;;  %v4110_v53 = vadd.f32 %v4022_v40, %v1413_v30  ;;  %vm1196_vm13 = vweird.f32 %v4036_v43 }
 0x259   :  { %v2729_v6 = vpop.eup %2728  ;;  %v1156_v26 = vmul.f32 %v2727_v47, %v1155_v13  ;;  %v1132_v23 = vadd.f32 %v4034_v22, %v1131_v14  ;;  %vm1173_vm14 = vweird.f32 %v4041_v42  ;;  %v1203_v41 = vor.u32 1.1754944e-38, %v1202_v20 }
 0x25a   :  { %v4071_v17 = vpop.eup %2730  ;;  %v4073_v33 = vadd.f32 1.0, %v2729_v6  ;;  %vm1178_vm1 = vcmp.eq.f32.partialorder %v1177_v1, 8.507059e+37 }
 0x25b   :  { %v2733_v35 = vpop.eup %2732  ;;  %v1192_v36 = vmul.f32 %v4071_v17, %v4036_v43  ;;  %v1157_v9 = vadd.f32 %v2727_v47, %v1156_v26  ;;  %vm1197_vm10 = vweird.f32 %v4071_v17  ;;  %v1136_v0 = vsel %vm4125_vm12, %v4034_v22, %v1132_v23 }
 0x25c   :  { %v4087_v38 = vpop.eup %2734  ;;  %2736 = vrcp.f32 %v4073_v33  ;;  %v1441_v31 = vpop.f32.mrf.mxu1  ;;  %v1225_v50 = vmul.f32 %v2733_v35, %v1126_v63  ;;  %vm4144_vm15 = vmor %vm1196_vm13, %vm1197_vm10  ;;  %vm1211_vm4 = vweird.f32 %v4073_v33 }
 0x25d   :  { %v1415_v10 = vpop.f32.mrf.mxu0  ;;  %v1169_v25 = vmul.f32 %v4087_v38, %v4041_v42  ;;  %v1193_v59 = vsub.f32 1.0, %v1192_v36  ;;  %v1161_v57 = vsel %vm1160_vm7, %v2727_v47, %v1157_v9  ;;  %v1522_v34 = vpop.f32.mrf.mxu2  ;;  %2738 = vtanh.f32 %v1104_v45 }
 0x25e   :  { %v1548_v51 = vpop.f32.mrf.mxu3  ;;  %v1166_v60 = vsel %vm4082_vm6, %v1165_v61, %v1161_v57  ;;  %v1179_v47 = vand.u32 2147483648, %v4041_v42  ;;  %v1416_v18 = vadd.f32 %v1415_v10, %v3931_v8  ;;  %v1442_v27 = vadd.f32 %v1441_v31, %v3921_v62  ;;  %v73_v42 = vld [vmem:[%s4301_s1 + $0x8] sm:$0xff] }
 0x25f   :  { %v1170_v12 = vsub.f32 1.0, %v1169_v25  ;;  %v1194_v28 = vmul.f32 %v4071_v17, %v1193_v59  ;;  %v1223_v15 = vmul.f32 %v1166_v60, %v72_v54  ;;  %vm1174_vm11 = vweird.f32 %v4087_v38 }
 0x260   :  { %v4130_v62 = vadd.f32 %v4048_v32, %v1416_v18  ;;  %v4133_v40 = vadd.f32 %v4050_v49, %v1442_v27  ;;  %v1200_v49 = vand.u32 2147483647, %v4036_v43  ;;  %vm1175_vm0 = vmor %vm1173_vm14, %vm1174_vm11  ;;  %v1180_v22 = vor.u32 1.1754944e-38, %v1179_v47 }
 0x261   :  { %v1171_v52 = vmul.f32 %v4087_v38, %v1170_v12  ;;  %v1227_v13 = vadd.f32 %v1225_v50, %v1223_v15  ;;  %v1195_v56 = vadd.f32 %v4071_v17, %v1194_v28  ;;  %v1141_v36 = vsel %vm4099_vm9, %v1140_v29, %v1136_v0 }
 0x262   :  { %v4117_v19 = vpop.eup %2736  ;;  %vm1201_vm2 = vcmp.eq.f32.partialorder %v1200_v49, 8.507059e+37  ;;  %v1215_v57 = vand.u32 2147483647, %v4073_v33 }
 0x263   :  { %v1207_v48 = vmul.f32 %v4117_v19, %v4073_v33  ;;  %2740 = vtanh.f32 %v1227_v13  ;;  %1235 = vst [vmem:[#allocation2 + $0x10] sm:$0xff] %v1227_v13  ;;  %v1172_v39 = vadd.f32 %v4087_v38, %v1171_v52  ;;  %v2739_v7 = vpop.eup %2738  ;;  %v1199_v35 = vsel %vm4144_vm15, %v4071_v17, %v1195_v56 }
 0x264   :  { %v1444_v26 = vpop.f32.mrf.mxu1  ;;  %v1226_v61 = vmul.f32 %v2739_v7, %v1141_v36  ;;  %v1204_v31 = vsel %vm1201_vm2, %v1203_v41, %v1199_v35  ;;  %vm1212_vm3 = vweird.f32 %v4117_v19  ;;  %vm1216_vm6 = vcmp.eq.f32.partialorder %v1215_v57, 8.507059e+37 }
 0x265   :  { %v1418_v6 = vpop.f32.mrf.mxu0  ;;  %v1208_v58 = vsub.f32 1.0, %v1207_v48  ;;  %v1445_v4 = vadd.f32 %v1444_v26, %v3956_v24  ;;  %v1525_v43 = vpop.f32.mrf.mxu2  ;;  %v1176_v9 = vsel %vm1175_vm0, %v4087_v38, %v1172_v39  ;;  %v1217_v38 = vand.u32 2147483648, %v4073_v33  ;;  %vm1213_vm5 = vmor %vm1211_vm4, %vm1212_vm3 }
 0x266   :  { %v1419_v30 = vadd.f32 %v1418_v6, %v3962_v16  ;;  %v1551_v14 = vpop.f32.mrf.mxu3  ;;  %v1181_v45 = vsel %vm1178_vm1, %v1180_v22, %v1176_v9 }
 0x267   :  { %v1209_v55 = vmul.f32 %v4117_v19, %v1208_v58  ;;  %v4166_v16 = vadd.f32 %v1548_v51, %v1445_v4  ;;  %v1224_v24 = vmul.f32 %v1181_v45, %v73_v42  ;;  %v1218_v12 = vor.u32 1.1754944e-38, %v1217_v38 }
 0x268   :  { %v4164_v54 = vadd.f32 %v1522_v34, %v1419_v30 }
 0x269   :  { %v2741_v10 = vpop.eup %2740  ;;  %v1228_v17 = vadd.f32 %v1226_v61, %v1224_v24  ;;  %v1210_v59 = vadd.f32 %v4117_v19, %v1209_v55 }
 0x26a   :  { %v1231_v25 = vmul.f32 %v2741_v10, %v1204_v31 }
 0x26b   :  { %2742 = vtanh.f32 %v1228_v17  ;;  %1236 = vst [vmem:[#allocation2 + $0x18] sm:$0xff] %v1228_v17  ;;  %v1214_v60 = vsel %vm1213_vm5, %v4117_v19, %v1210_v59 }
 0x26c   :  { %1233 = vst [vmem:[#allocation2] sm:$0xff] %v1231_v25  ;;  %v1447_v63 = vpop.f32.mrf.mxu1  ;;  %v1219_v15 = vsel %vm1216_vm6, %v1218_v12, %v1214_v60 }
 0x26d   :  { %v1421_v29 = vpop.f32.mrf.mxu0  ;;  %v1448_v34 = vadd.f32 %v1447_v63, %v3992_v11  ;;  %v1732_v20 = vpop.f32.mrf.mxu2 }
 0x26e   :  { %v1422_v2 = vadd.f32 %v1421_v29, %v3990_v21  ;;  %v1554_v51 = vpop.f32.mrf.mxu3 }
 0x26f   :  { %v4178_v23 = vadd.f32 %v1551_v14, %v1448_v34 }
 0x270   :  { %v4176_v50 = vadd.f32 %v1525_v43, %v1422_v2 }
 0x271   :  { %v2743_v28 = vpop.eup %2742 }
 0x272   :  { %v1232_v47 = vmul.f32 %v2743_v28, %v1219_v15 }
 0x274   :  { %v1450_v33 = vpop.f32.mrf.mxu1  ;;  %1234 = vst [vmem:[#allocation2 + $0x8] sm:$0xff] %v1232_v47 }
 0x275   :  { %v1628_v18 = vpop.f32.mrf.mxu0  ;;  %v1451_v21 = vadd.f32 %v1450_v33, %v4020_v37  ;;  %v1735_v27 = vpop.f32.mrf.mxu2 }
 0x276   :  { %v1669_v11 = vadd.f32 %v1628_v18, %v4110_v53  ;;  %v1761_v52 = vpop.f32.mrf.mxu3 }
 0x277   :  { %v4182_v13 = vadd.f32 %v1554_v51, %v1451_v21 }
 0x278   :  { %v1773_v1 = vadd.f32 %v1732_v20, %v1669_v11 }
 0x27c   :  { %v1657_v56 = vpop.f32.mrf.mxu1 }
 0x27d   :  { %v1631_v19 = vpop.f32.mrf.mxu0  ;;  %v1670_v8 = vadd.f32 %v1657_v56, %v4133_v40  ;;  %v1738_v48 = vpop.f32.mrf.mxu2 }
 0x27e   :  { %v1764_v0 = vpop.f32.mrf.mxu3  ;;  %v1671_v25 = vadd.f32 %v1631_v19, %v4130_v62 }
 0x27f   :  { %v1774_v32 = vadd.f32 %v1761_v52, %v1670_v8 }
 0x280   :  { %v1775_v29 = vadd.f32 %v1735_v27, %v1671_v25 }
 0x284   :  { %v1660_v41 = vpop.f32.mrf.mxu1 }
 0x285   :  { %v1634_v49 = vpop.f32.mrf.mxu0  ;;  %v1741_v39 = vpop.f32.mrf.mxu2  ;;  %v1672_v60 = vadd.f32 %v1660_v41, %v4166_v16 }
 0x286   :  { %v4185_v6 = vpop.f32.mrf.mxu3  ;;  %v1673_v20 = vadd.f32 %v1634_v49, %v4164_v54 }
 0x287   :  { %v1776_v11 = vadd.f32 %v1764_v0, %v1672_v60 }
 0x288   :  { %v1777_v33 = vadd.f32 %v1738_v48, %v1673_v20 }
 0x28c   :  { %v1663_v26 = vpop.f32.mrf.mxu1 }
 0x28d   :  { %v1637_v37 = vpop.f32.mrf.mxu0  ;;  %v1956_v7 = vpop.f32.mrf.mxu2  ;;  %v1674_v41 = vadd.f32 %v1663_v26, %v4178_v23 }
 0x28e   :  { %v4187_v53 = vpop.f32.mrf.mxu3  ;;  %v1675_v54 = vadd.f32 %v1637_v37, %v4176_v50 }
 0x294   :  { %v4189_v22 = vpop.f32.mrf.mxu1 }
 0x295   :  { %v1844_v58 = vpop.f32.mrf.mxu0  ;;  %v1959_v42 = vpop.f32.mrf.mxu2  ;;  %v1676_v25 = vadd.f32 %v4189_v22, %v4182_v13 }
 0x296   :  { %v1985_v30 = vpop.f32.mrf.mxu3  ;;  %v1885_v10 = vadd.f32 %v1844_v58, %v1773_v1 }
 0x297   :  { %v1780_v22 = vadd.f32 %v4187_v53, %v1676_v25 }
 0x298   :  { %v1997_v17 = vadd.f32 %v1956_v7, %v1885_v10 }
 0x29c   :  { %v1873_v40 = vpop.f32.mrf.mxu1 }
 0x29d   :  { %v1847_v4 = vpop.f32.mrf.mxu0  ;;  %v1962_v43 = vpop.f32.mrf.mxu2  ;;  %v1886_v2 = vadd.f32 %v1873_v40, %v1774_v32 }
 0x29e   :  { %v1988_v14 = vpop.f32.mrf.mxu3  ;;  %v1887_v57 = vadd.f32 %v1847_v4, %v1775_v29  ;;  %v1779_v4 = vadd.f32 %v1741_v39, %v1675_v54 }
 0x29f   :  { %v1998_v47 = vadd.f32 %v1985_v30, %v1886_v2 }
 0x2a0   :  { %v1999_v15 = vadd.f32 %v1959_v42, %v1887_v57 }
 0x2a4   :  { %v1876_v36 = vpop.f32.mrf.mxu1 }
 0x2a5   :  { %v1850_v35 = vpop.f32.mrf.mxu0  ;;  %v4191_v9 = vpop.f32.mrf.mxu2  ;;  %v1888_v19 = vadd.f32 %v1876_v36, %v1776_v11 }
 0x2a6   :  { %v4193_v55 = vpop.f32.mrf.mxu3  ;;  %v1889_v1 = vadd.f32 %v1850_v35, %v1777_v33 }
 0x2a7   :  { %v2000_v58 = vadd.f32 %v1988_v14, %v1888_v19 }
 0x2a8   :  { %v2001_v7 = vadd.f32 %v1962_v43, %v1889_v1 }
 0x2ac   :  { %v1879_v24 = vpop.f32.mrf.mxu1 }
 0x2ad   :  { %v1853_v45 = vpop.f32.mrf.mxu0  ;;  %v2172_v61 = vpop.f32.mrf.mxu2 }
 0x2ae   :  { %v4195_v31 = vpop.f32.mrf.mxu3  ;;  %v1891_v23 = vadd.f32 %v1853_v45, %v1779_v4 }
 0x2b4   :  { %v4198_v59 = vpop.f32.mrf.mxu1 }
 0x2b5   :  { %v2060_v38 = vpop.f32.mrf.mxu0  ;;  %v2175_v51 = vpop.f32.mrf.mxu2 }
 0x2b6   :  { %v2101_v63 = vadd.f32 %v2060_v38, %v1997_v17  ;;  %v2201_v28 = vpop.f32.mrf.mxu3  ;;  %v2003_v38 = vadd.f32 %v4191_v9, %v1891_v23 }
 0x2b8   :  { %v2213_v34 = vadd.f32 %v2172_v61, %v2101_v63 }
 0x2ba   :  { %v2221_v12 = vadd.f32 %v2213_v34, %v3926_v5 }
 0x2bc   :  { %v2660_v62 = vmul.f32 -1.442695, %v2221_v12  ;;  %v2089_v21 = vpop.f32.mrf.mxu1 }
 0x2bd   :  { %v2063_v18 = vpop.f32.mrf.mxu0  ;;  %v2102_v52 = vadd.f32 %v2089_v21, %v1998_v47  ;;  %v2178_v49 = vpop.f32.mrf.mxu2 }
 0x2be   :  { %2744 = vpow2.f32 %v2660_v62  ;;  %v2103_v27 = vadd.f32 %v2063_v18, %v1999_v15  ;;  %v2204_v30 = vpop.f32.mrf.mxu3  ;;  %v1892_v15 = vadd.f32 %v4198_v59, %v1780_v22 }
 0x2bf   :  { %v2214_v8 = vadd.f32 %v2201_v28, %v2102_v52 }
 0x2c0   :  { %v2215_v56 = vadd.f32 %v2175_v51, %v2103_v27  ;;  %v2004_v52 = vadd.f32 %v4195_v31, %v1892_v15 }
 0x2c1   :  { %v2222_v32 = vadd.f32 %v2214_v8, %v3926_v5  ;;  %v1778_v5 = vadd.f32 %v4185_v6, %v1674_v41 }
 0x2c2   :  { %v2223_v16 = vadd.f32 %v2215_v56, %v3954_v3 }
 0x2c3   :  { %v2661_v42 = vmul.f32 -1.442695, %v2222_v32  ;;  %v1890_v14 = vadd.f32 %v1879_v24, %v1778_v5 }
 0x2c4   :  { %v2745_v48 = vpop.eup %2744  ;;  %v2267_v0 = vadd.f32 1.0, %v2223_v16  ;;  %v2092_v36 = vpop.f32.mrf.mxu1 }
 0x2c5   :  { %v4207_v40 = vadd.f32 1.0, %v2745_v48  ;;  %v2066_v35 = vpop.f32.mrf.mxu0  ;;  %2746 = vpow2.f32 %v2661_v42  ;;  %v2104_v37 = vadd.f32 %v2092_v36, %v2000_v58  ;;  %v2181_v6 = vpop.f32.mrf.mxu2  ;;  %v2002_v45 = vadd.f32 %v4193_v55, %v1890_v14 }
 0x2c6   :  { %v2662_v61 = vmul.f32 -1.442695, %v2267_v0  ;;  %v2105_v50 = vadd.f32 %v2066_v35, %v2001_v7  ;;  %v2207_v13 = vpop.f32.mrf.mxu3 }
 0x2c7   :  { %2748 = vrcp.f32 %v4207_v40  ;;  %v2216_v43 = vadd.f32 %v2204_v30, %v2104_v37  ;;  %v2248_v53 = vand.u32 2147483648, %v4207_v40  ;;  %vm2242_vm8 = vweird.f32 %v4207_v40 }
 0x2c8   :  { %2750 = vpow2.f32 %v2662_v61  ;;  %v2217_v26 = vadd.f32 %v2178_v49, %v2105_v50  ;;  %v2246_v59 = vand.u32 2147483647, %v4207_v40 }
 0x2c9   :  { %v2224_v39 = vadd.f32 %v2216_v43, %v3954_v3  ;;  %v2249_v7 = vor.u32 1.1754944e-38, %v2248_v53  ;;  %v2525_v53 = vld [vmem:[%s4301_s1 + $0x18] sm:$0xff] }
 0x2ca   :  { %v2225_v10 = vadd.f32 %v2217_v26, %v3985_v44  ;;  %vm2247_vm10 = vcmp.eq.f32.partialorder %v2246_v59, 8.507059e+37 }
 0x2cb   :  { %v2747_v17 = vpop.eup %2746  ;;  %v2268_v63 = vadd.f32 1.0, %v2224_v39  ;;  %v2524_v39 = vld [vmem:[%s4301_s1 + $0x10] sm:$0xff]  ;;  %s2812_s1 = smov [#allocation2]  }
 0x2cc   :  { %v2664_v29 = vmul.f32 -1.442695, %v2225_v10  ;;  %v4217_v2 = vadd.f32 1.0, %v2747_v17  ;;  %v2095_v24 = vpop.f32.mrf.mxu1  ;;  %s2366_s15 = sshll.u32 %s2812_s1, 4  ;;  %s2367_s15 = int_to_ptr.vmem [resolvable:$true] %s2366_s15 }
 0x2cd   :  { %v2749_v57 = vpop.eup %2748  ;;  %v2069_v34 = vpop.f32.mrf.mxu0  ;;  %v2663_v3 = vmul.f32 -1.442695, %v2268_v63  ;;  %v2106_v12 = vadd.f32 %v2095_v24, %v2002_v45 }
 0x2ce   :  { %v2751_v51 = vpop.eup %2750  ;;  %v2238_v20 = vmul.f32 %v2749_v57, %v4207_v40  ;;  %2752 = vpow2.f32 %v2664_v29  ;;  %v2107_v60 = vadd.f32 %v2069_v34, %v2003_v38  ;;  %vm2243_vm7 = vweird.f32 %v2749_v57  ;;  %v2210_v58 = vpop.f32.mrf.mxu3 }
 0x2cf   :  { %v4221_v9 = vadd.f32 1.0, %v2751_v51  ;;  %2754 = vrcp.f32 %v4217_v2  ;;  %v2218_v33 = vadd.f32 %v2207_v13, %v2106_v12  ;;  %vm4238_vm9 = vmor %vm2242_vm8, %vm2243_vm7  ;;  %vm2257_vm13 = vweird.f32 %v4217_v2 }
 0x2d0   :  { %v2239_v28 = vsub.f32 1.0, %v2238_v20  ;;  %2756 = vpow2.f32 %v2663_v3  ;;  %v2219_v55 = vadd.f32 %v2181_v6, %v2107_v60  ;;  %v2261_v25 = vand.u32 2147483647, %v4217_v2 }
 0x2d1   :  { %2758 = vrcp.f32 %v4221_v9  ;;  %v2226_v11 = vadd.f32 %v2218_v33, %v3985_v44  ;;  %v2288_v4 = vand.u32 2147483648, %v4221_v9  ;;  %v2286_v50 = vand.u32 2147483647, %v4221_v9 }
 0x2d2   :  { %v2227_v47 = vadd.f32 %v2219_v55, %v4025_v46  ;;  %v2240_v62 = vmul.f32 %v2749_v57, %v2239_v28  ;;  %vm2282_vm12 = vweird.f32 %v4221_v9  ;;  %vm2262_vm2 = vcmp.eq.f32.partialorder %v2261_v25, 8.507059e+37 }
 0x2d3   :  { %v2665_v44 = vmul.f32 -1.442695, %v2226_v11  ;;  %v2289_v10 = vor.u32 1.1754944e-38, %v2288_v4  ;;  %vm2287_vm0 = vcmp.eq.f32.partialorder %v2286_v50, 8.507059e+37 }
 0x2d4   :  { %v2753_v18 = vpop.eup %2752  ;;  %v2241_v21 = vadd.f32 %v2749_v57, %v2240_v62  ;;  %2760 = vtanh.f32 %v2227_v47  ;;  %v2098_v19 = vpop.f32.mrf.mxu1 }
 0x2d5   :  { %v4229_v27 = vpop.eup %2754  ;;  %v4232_v1 = vadd.f32 1.0, %v2753_v18  ;;  %v2108_v32 = vadd.f32 %v2098_v19, %v2004_v52 }
 0x2d6   :  { %v2757_v56 = vpop.eup %2756  ;;  %v2253_v8 = vmul.f32 %v4229_v27, %v4217_v2  ;;  %v2245_v31 = vsel %vm4238_vm9, %v2749_v57, %v2241_v21  ;;  %vm2258_vm14 = vweird.f32 %v4229_v27 }
 0x2d7   :  { %v2759_v16 = vpop.eup %2758  ;;  %2762 = vrcp.f32 %v4232_v1  ;;  %v4246_v48 = vadd.f32 1.0, %v2757_v56  ;;  %v2250_v30 = vsel %vm2247_vm10, %v2249_v7, %v2245_v31  ;;  %v2220_v35 = vadd.f32 %v2210_v58, %v2108_v32  ;;  %vm4271_vm1 = vmor %vm2257_vm13, %vm2258_vm14 }
 0x2d8   :  { %v2278_v49 = vmul.f32 %v2759_v16, %v4221_v9  ;;  %v2254_v41 = vsub.f32 1.0, %v2253_v8  ;;  %2764 = vpow2.f32 %v2665_v44  ;;  %vm2283_vm11 = vweird.f32 %v2759_v16 }
 0x2d9   :  { %2766 = vrcp.f32 %v4246_v48  ;;  %v2228_v5 = vadd.f32 %v2220_v35, %v4025_v46  ;;  %vm2284_vm15 = vmor %vm2282_vm12, %vm2283_vm11  ;;  %v2263_v46 = vand.u32 2147483648, %v4217_v2  ;;  %v2303_v60 = vand.u32 2147483648, %v4246_v48 }
 0x2da   :  { %v2761_v0 = vpop.eup %2760  ;;  %v2279_v42 = vsub.f32 1.0, %v2278_v49  ;;  %v2255_v36 = vmul.f32 %v4229_v27, %v2254_v41  ;;  %v2301_v13 = vand.u32 2147483647, %v4246_v48  ;;  %vm2320_vm5 = vweird.f32 %v4232_v1 }
 0x2db   :  { %v2349_v40 = vmul.f32 %v2761_v0, %v2250_v30  ;;  %2768 = vtanh.f32 %v2228_v5  ;;  %v2264_v3 = vor.u32 1.1754944e-38, %v2263_v46  ;;  %v2326_v55 = vand.u32 2147483648, %v4232_v1 }
 0x2dc   :  { %v2280_v61 = vmul.f32 %v2759_v16, %v2279_v42  ;;  %v2256_v43 = vadd.f32 %v4229_v27, %v2255_v36  ;;  %v2324_v62 = vand.u32 2147483647, %v4232_v1  ;;  %vm2297_vm7 = vweird.f32 %v4246_v48 }
 0x2dd   :  { %v4252_v37 = vpop.eup %2762  ;;  %v2304_v21 = vor.u32 1.1754944e-38, %v2303_v60  ;;  %vm2302_vm9 = vcmp.eq.f32.partialorder %v2301_v13, 8.507059e+37  ;;  %v2327_v59 = vor.u32 1.1754944e-38, %v2326_v55 }
 0x2de   :  { %v2316_v23 = vmul.f32 %v4252_v37, %v4232_v1  ;;  %v2281_v26 = vadd.f32 %v2759_v16, %v2280_v61  ;;  %v2765_v14 = vpop.eup %2764  ;;  %v2260_v51 = vsel %vm4271_vm1, %v4229_v27, %v2256_v43  ;;  %vm2321_vm3 = vweird.f32 %v4252_v37 }
 0x2df   :  { %v2767_v17 = vpop.eup %2766  ;;  %v2314_v63 = vadd.f32 1.0, %v2765_v14  ;;  %v2265_v28 = vsel %vm2262_vm2, %v2264_v3, %v2260_v51  ;;  %vm4285_vm6 = vmor %vm2320_vm5, %vm2321_vm3  ;;  %vm2325_vm10 = vcmp.eq.f32.partialorder %v2324_v62, 8.507059e+37 }
 0x2e0   :  { %v2317_v38 = vsub.f32 1.0, %v2316_v23  ;;  %v2285_v29 = vsel %vm2284_vm15, %v2759_v16, %v2281_v26  ;;  %v2293_v6 = vmul.f32 %v2767_v17, %v4246_v48  ;;  %vm2298_vm4 = vweird.f32 %v2767_v17 }
 0x2e1   :  { %v2290_v57 = vsel %vm2287_vm0, %v2289_v10, %v2285_v29  ;;  %2770 = vrcp.f32 %v2314_v63  ;;  %v2769_v22 = vpop.eup %2768  ;;  %vm2299_vm8 = vmor %vm2297_vm7, %vm2298_vm4  ;;  %v2341_v49 = vand.u32 2147483648, %v2314_v63  ;;  %vm2335_vm12 = vweird.f32 %v2314_v63 }
 0x2e2   :  { %v2318_v34 = vmul.f32 %v4252_v37, %v2317_v38  ;;  %v2347_v24 = vmul.f32 %v2524_v39, %v2290_v57  ;;  %v2294_v20 = vsub.f32 1.0, %v2293_v6  ;;  %v2350_v15 = vmul.f32 %v2769_v22, %v2265_v28 }
 0x2e3   :  { %v2339_v41 = vand.u32 2147483647, %v2314_v63  ;;  %v2342_v7 = vor.u32 1.1754944e-38, %v2341_v49 }
 0x2e4   :  { %v2351_v2 = vadd.f32 %v2349_v40, %v2347_v24  ;;  %v2319_v9 = vadd.f32 %v4252_v37, %v2318_v34  ;;  %v2295_v12 = vmul.f32 %v2767_v17, %v2294_v20 }
 0x2e5   :  { %vm2340_vm14 = vcmp.eq.f32.partialorder %v2339_v41, 8.507059e+37 }
 0x2e6   :  { %2772 = vtanh.f32 %v2351_v2  ;;  %2360 = vst [vmem:[#allocation2 + $0x30] sm:$0xff] %v2351_v2  ;;  %v2296_v33 = vadd.f32 %v2767_v17, %v2295_v12  ;;  %v2323_v11 = vsel %vm4285_vm6, %v4252_v37, %v2319_v9 }
 0x2e7   :  { %v2771_v18 = vpop.eup %2770  ;;  %v2328_v54 = vsel %vm2325_vm10, %v2327_v59, %v2323_v11 }
 0x2e8   :  { %v2331_v27 = vmul.f32 %v2771_v18, %v2314_v63  ;;  %v2300_v52 = vsel %vm2299_vm8, %v2767_v17, %v2296_v33  ;;  %vm2336_vm11 = vweird.f32 %v2771_v18 }
 0x2e9   :  { %v2305_v19 = vsel %vm2302_vm9, %v2304_v21, %v2300_v52  ;;  %vm2337_vm13 = vmor %vm2335_vm12, %vm2336_vm11 }
 0x2ea   :  { %v2332_v1 = vsub.f32 1.0, %v2331_v27  ;;  %v2348_v56 = vmul.f32 %v2525_v53, %v2305_v19 }
 0x2ec   :  { %v2773_v8 = vpop.eup %2772  ;;  %v2333_v16 = vmul.f32 %v2771_v18, %v2332_v1  ;;  %v2352_v31 = vadd.f32 %v2350_v15, %v2348_v56 }
 0x2ed   :  { %v2355_v44 = vmul.f32 %v2773_v8, %v2328_v54 }
 0x2ee   :  { %v2334_v32 = vadd.f32 %v2771_v18, %v2333_v16  ;;  %2774 = vtanh.f32 %v2352_v31  ;;  %2361 = vst [vmem:[#allocation2 + $0x38] sm:$0xff] %v2352_v31 }
 0x2ef   :  { %2358 = vst [vmem:[#allocation2 + $0x20] sm:$0xff] %v2355_v44 }
 0x2f0   :  { %v2338_v48 = vsel %vm2337_vm13, %v2771_v18, %v2334_v32 }
 0x2f1   :  { %v2343_v0 = vsel %vm2340_vm14, %v2342_v7, %v2338_v48 }
 0x2f4   :  { %v2775_v58 = vpop.eup %2774 }
 0x2f5   :  { %v2356_v42 = vmul.f32 %v2775_v58, %v2343_v0 }
 0x2f7   :  { %2359 = vst [vmem:[#allocation2 + $0x28] sm:$0xff] %v2356_v42 }
 0x2f8   :  { %2374 = dma.vmem_to_hbm [thread:$0]  %s2367_s15, 1024, %s2369_s27, [#allocation3], %s2813_s29, %s2813_s29, %s2814_s14  }
 0x2f9   :  { %2800 = dma.done.wait [#allocation3], 1024  }
 0x2fa   :  { %2801 = vsyncadd [#allocation3], 4294966272 }
 0x2fb   :  { %2379 = vsyncpa [#allocation3], 1 }

</bundles_post_ra>
